<compile_context>
chip_gen: v6e
topology: v6e:2x2x1
jax: 0.10.0
libtpu: 0.0.40
codegen_flags: <defaults>
</compile_context>

<pallas_src>
import functools
import math

import jax
import jax.numpy as jnp
from jax.experimental import pallas as pl
from jax.experimental.pallas import tpu as pltpu


def _round_up(x, m):
    return ((x + m - 1) // m) * m


def _nbytes(shape, dtype):
    return math.prod(shape) * jnp.dtype(dtype).itemsize


# ----------------------------------------------------------------------------
# Fused kernel: per-chunk GRU recurrence + last-state select + Linear head
#               + LogSoftmax (head only on the final time chunk)
# ----------------------------------------------------------------------------
def _rnn_fused_kernel(TC, O,
                      emb_ref, len_ref, img_ref, h0_ref,
                      wih_ref, whh_ref, bi_ref, bhn_ref,
                      whid_ref, wimg_ref, bout_ref,
                      out_ref, gi_sc, h_sc, sel_sc):
    """Block shapes (all padded):
      emb_ref : (TC, TB, Hp) bf16   time-major embedding chunk
      len_ref : (TB, 1)      int32  gather index per batch row
      img_ref : (TB, Ip)     bf16
      h0_ref  : (TB, Hp)     f32
      wih/whh : (Hp, 3*Hp)   bf16   gate-aligned [r | z | n] 128-lane blocks
      bi_ref  : (1, 3*Hp)    f32    b_ih with b_hr / b_hz folded in
      bhn_ref : (1, Hp)      f32    b_hn (must stay inside the r*(...) term)
      whid/wimg/bout : split head weights (concat removed)
      out_ref : (TB, Op)     f32    log-probabilities (lane-dense)
      gi_sc   : VMEM (TC*TB, 3*Hp) f32   per-chunk input projection
      h_sc/sel_sc : VMEM (TB, Hp)  f32   recurrent state carried across chunks
    """
    c = pl.program_id(1)
    TB, Hp = h0_ref.shape

    @pl.when(c == 0)
    def _():
        h_sc[...] = h0_ref[...]
        sel_sc[...] = h0_ref[...]

    # Hoisted input projection for this chunk: one MXU matmul with TC*TB rows
    # (bf16 operands, f32 accumulate).  Bias (with b_hr/b_hz folded) added here.
    emb = emb_ref[...].reshape(TC * TB, Hp)
    gi_sc[...] = (
        jnp.dot(emb, wih_ref[...], preferred_element_type=jnp.float32)
        + bi_ref[...])

    bhn = bhn_ref[...]              # tiny, fine to hoist
    lens = len_ref[...]             # (TB, 1) int32
    base_t = c * TC

    h = h_sc[...]
    sel = sel_sc[...]
    # Short per-chunk unrolled recurrence; long sequences are handled by the
    # time-chunk grid axis, so code size / vreg live ranges stay bounded.
    # TODO(synk): for genuinely tiny batch tiles, staging W_hh once via
    # pltpu.matmul_push_rhs and reusing it across all steps would amortize the
    # per-step weight push; skipped here in favor of larger batch tiles.
    for t in range(TC):
        gi = gi_sc[pl.ds(t * TB, TB), :]                 # static aligned slice
        # W_hh streams from VMEM on every dot (not pinned in vregs).
        gh = jnp.dot(h.astype(jnp.bfloat16), whh_ref[...],
                     preferred_element_type=jnp.float32)
        r = jax.nn.sigmoid(gi[:, 0 * Hp:1 * Hp] + gh[:, 0 * Hp:1 * Hp])
        z = jax.nn.sigmoid(gi[:, 1 * Hp:2 * Hp] + gh[:, 1 * Hp:2 * Hp])
        n = jnp.tanh(gi[:, 2 * Hp:3 * Hp] + r * (gh[:, 2 * Hp:3 * Hp] + bhn))
        h = (1.0 - z) * n + z * h
        sel = jnp.where(lens == base_t + t, h, sel)      # encodings.gather(1, len)
    h_sc[...] = h
    sel_sc[...] = sel

    # Fused head on the final chunk: Linear(hidden ++ image -> output) without
    # materializing the concat, then LogSoftmax masked to the O valid lanes.
    @pl.when(c == pl.num_programs(1) - 1)
    def _():
        logits = (
            jnp.dot(sel.astype(jnp.bfloat16), whid_ref[...],
                    preferred_element_type=jnp.float32)
            + jnp.dot(img_ref[...], wimg_ref[...],
                      preferred_element_type=jnp.float32)
            + bout_ref[...])
        col = jax.lax.broadcasted_iota(jnp.int32, logits.shape, 1)
        logits = jnp.where(col < O, logits, jnp.full_like(logits, -1e30))
        m = jnp.max(logits, axis=1, keepdims=True)
        s = logits - m
        lse = jnp.log(jnp.sum(jnp.exp(s), axis=1, keepdims=True))
        out_ref[...] = (s - lse).astype(out_ref.dtype)


# ----------------------------------------------------------------------------
# Parameter construction (PyTorch layout) and padded Pallas layout
# ----------------------------------------------------------------------------
def init_torch_params(key, vocab_size, image_size, hidden_size, output_size):
    ks = jax.random.split(key, 7)
    H = hidden_size
    scale = 1.0 / jnp.sqrt(jnp.float32(H))

    emb = jax.random.normal(ks[0], (vocab_size + 1, H), jnp.float32)
    emb = emb.at[vocab_size].set(0.0)                 # padding_idx = vocab_size

    w_ih = jax.random.uniform(ks[1], (3 * H, H), jnp.float32, -scale, scale)
    w_hh = jax.random.uniform(ks[2], (3 * H, H), jnp.float32, -scale, scale)
    b_ih = jax.random.uniform(ks[3], (3 * H,), jnp.float32, -scale, scale)
    b_hh = jax.random.uniform(ks[4], (3 * H,), jnp.float32, -scale, scale)

    fan_in = image_size + H
    lscale = 1.0 / jnp.sqrt(jnp.float32(fan_in))
    w_out = jax.random.uniform(ks[5], (output_size, fan_in), jnp.float32,
                               -lscale, lscale)
    b_out = jax.random.uniform(ks[6], (output_size,), jnp.float32,
                               -lscale, lscale)

    return {"embedding": emb, "w_ih": w_ih, "w_hh": w_hh, "b_ih": b_ih,
            "b_hh": b_hh, "w_out": w_out, "b_out": b_out}


def prepare_pallas_params(tp, vocab_size, image_size, hidden_size, output_size):
    H, I, O = hidden_size, image_size, output_size
    Hp, Ip, Op = _round_up(H, 128), _round_up(I, 128), _round_up(O, 128)

    # Embedding table in bf16 (MXU operand + halves the gather HBM round trip).
    emb = jnp.zeros((vocab_size + 1, Hp), jnp.float32).at[:, :H].set(
        tp["embedding"]).astype(jnp.bfloat16)

    w_ih, w_hh = tp["w_ih"], tp["w_hh"]       # (3H, H), PyTorch gate order [r,z,n]
    b_ih, b_hh = tp["b_ih"], tp["b_hh"]

    wih_p = jnp.zeros((Hp, 3 * Hp), jnp.float32)
    whh_p = jnp.zeros((Hp, 3 * Hp), jnp.float32)
    for g in range(3):                        # each gate in its own 128-lane block
        wih_p = wih_p.at[:H, g * Hp:g * Hp + H].set(w_ih[g * H:(g + 1) * H, :].T)
        whh_p = whh_p.at[:H, g * Hp:g * Hp + H].set(w_hh[g * H:(g + 1) * H, :].T)
    wih_p = wih_p.astype(jnp.bfloat16)
    whh_p = whh_p.astype(jnp.bfloat16)

    # Fold b_hr / b_hz into the precomputed input-side bias; keep b_hn separate
    # (it must stay inside the r*(...) term).  Biases stay f32.
    b_i = jnp.zeros((1, 3 * Hp), jnp.float32)
    b_i = b_i.at[0, 0 * Hp:0 * Hp + H].set(b_ih[0:H] + b_hh[0:H])
    b_i = b_i.at[0, 1 * Hp:1 * Hp + H].set(b_ih[H:2 * H] + b_hh[H:2 * H])
    b_i = b_i.at[0, 2 * Hp:2 * Hp + H].set(b_ih[2 * H:3 * H])
    b_hn = jnp.zeros((1, Hp), jnp.float32).at[0, :H].set(b_hh[2 * H:3 * H])

    # Split the output Linear so concat([hidden, image]) never materializes.
    w_out, b_out = tp["w_out"], tp["b_out"]   # (O, H + I): hidden cols first
    w_hid = jnp.zeros((Hp, Op), jnp.float32).at[:H, :O].set(
        w_out[:, :H].T).astype(jnp.bfloat16)
    w_img = jnp.zeros((Ip, Op), jnp.float32).at[:I, :O].set(
        w_out[:, H:].T).astype(jnp.bfloat16)
    b_o = jnp.zeros((1, Op), jnp.float32).at[0, :O].set(b_out)

    return {"emb": emb, "w_ih_t": wih_p, "w_hh_t": whh_p, "b_i": b_i,
            "b_hn": b_hn, "w_hid": w_hid, "w_img": w_img, "b_out": b_o,
            "hidden_size": H, "image_size": I, "output_size": O,
            "padding_idx": vocab_size}


# ----------------------------------------------------------------------------
# Forward pass wrapper (embedding gather + padding stays in JAX glue)
# ----------------------------------------------------------------------------
def rnn_model_forward(params, questions, images, question_lengths, h0):
    B, S = questions.shape
    H = params["hidden_size"]
    O = params["output_size"]
    I = params["image_size"]
    pad_idx = params["padding_idx"]

    Hp = params["emb"].shape[1]
    Ip = params["w_img"].shape[0]
    Op = params["w_hid"].shape[1]

    # Batch tile: multiple of 8 sublanes, up to 128; the grid's parallel axis
    # handles multi-tile batches and megacore sharding on v7x.
    Bp0 = _round_up(max(B, 8), 8)
    TB = min(128, Bp0)
    Bp = _round_up(Bp0, TB)
    nb = Bp // TB

    # Time chunk: bounds the per-invocation gi scratch / emb block so the
    # kernel fits v7x's 64 MiB VMEM and lets emb DMA pipeline behind compute.
    TC = min(8, S)
    Sc = _round_up(S, TC)
    nc = Sc // TC

    # TODO(synk): the embedding lookup is a data-dependent vocab gather; kept in
    # XLA glue (bf16 table halves the HBM round trip). An in-kernel DMA gather
    # via scalar-prefetched token ids is possible but not worthwhile here.
    # Transpose the (tiny) index array BEFORE the gather so time-major
    # (Sc, Bp, Hp) activations are produced directly (no activation relayout).
    q = jnp.transpose(questions).astype(jnp.int32)               # (S, B)
    q = jnp.pad(q, ((0, Sc - S), (0, Bp - B)), constant_values=pad_idx)
    emb = jnp.take(params["emb"], q, axis=0)                     # (Sc, Bp, Hp) bf16

    img = jnp.pad(images.astype(jnp.float32),
                  ((0, Bp - B), (0, Ip - I))).astype(jnp.bfloat16)
    h0p = jnp.pad(h0.astype(jnp.float32), ((0, Bp - B), (0, Hp - H)))

    # PyTorch gathers encodings at index == question_lengths (not lengths-1);
    # clamp explicitly so out-of-range indices behave like a clamped gather.
    lens = jnp.clip(question_lengths.astype(jnp.int32), 0, S - 1)
    lens = jnp.pad(lens, (0, Bp - B)).reshape(Bp, 1)

    # Explicit VMEM budget: resident blocks (inputs/outputs double-buffered)
    # + scratch, with 2x headroom, capped well below any chip's physical VMEM.
    resident = (
        2 * _nbytes((TC, TB, Hp), jnp.bfloat16)            # emb chunk
        + 2 * _nbytes((TB, 1), jnp.int32)
        + 2 * _nbytes((TB, Ip), jnp.bfloat16)
        + 2 * _nbytes((TB, Hp), jnp.float32)               # h0
        + 2 * 2 * _nbytes((Hp, 3 * Hp), jnp.bfloat16)      # w_ih, w_hh
        + 2 * (_nbytes((1, 3 * Hp), jnp.float32)
               + _nbytes((1, Hp), jnp.float32)
               + _nbytes((1, Op), jnp.float32))
        + 2 * (_nbytes((Hp, Op), jnp.bfloat16)
               + _nbytes((Ip, Op), jnp.bfloat16))
        + 2 * _nbytes((TB, Op), jnp.float32)               # out
        + _nbytes((TC * TB, 3 * Hp), jnp.float32)          # gi scratch
        + 2 * _nbytes((TB, Hp), jnp.float32))              # h / sel scratch
    vmem_limit = int(min(max(2 * resident, 16 * 1024 * 1024),
                         100 * 1024 * 1024))

    kernel = functools.partial(_rnn_fused_kernel, TC, O)
    out = pl.pallas_call(
        kernel,
        out_shape=jax.ShapeDtypeStruct((Bp, Op), jnp.float32),
        grid_spec=pltpu.PrefetchScalarGridSpec(
            num_scalar_prefetch=0,
            grid=(nb, nc),
            in_specs=[
                pl.BlockSpec((TC, TB, Hp), lambda b, c: (c, b, 0)),
                pl.BlockSpec((TB, 1), lambda b, c: (b, 0)),
                pl.BlockSpec((TB, Ip), lambda b, c: (b, 0)),
                pl.BlockSpec((TB, Hp), lambda b, c: (b, 0)),
                # Weights / biases: constant block index -> fetched once.
                pl.BlockSpec((Hp, 3 * Hp), lambda b, c: (0, 0)),
                pl.BlockSpec((Hp, 3 * Hp), lambda b, c: (0, 0)),
                pl.BlockSpec((1, 3 * Hp), lambda b, c: (0, 0)),
                pl.BlockSpec((1, Hp), lambda b, c: (0, 0)),
                pl.BlockSpec((Hp, Op), lambda b, c: (0, 0)),
                pl.BlockSpec((Ip, Op), lambda b, c: (0, 0)),
                pl.BlockSpec((1, Op), lambda b, c: (0, 0)),
            ],
            out_specs=pl.BlockSpec((TB, Op), lambda b, c: (b, 0)),
            scratch_shapes=[
                pltpu.VMEM((TC * TB, 3 * Hp), jnp.float32),   # gi (per chunk)
                pltpu.VMEM((TB, Hp), jnp.float32),            # h  (carried)
                pltpu.VMEM((TB, Hp), jnp.float32),            # sel (carried)
            ],
        ),
        compiler_params=pltpu.CompilerParams(
            dimension_semantics=("parallel", "arbitrary"),
            vmem_limit_bytes=vmem_limit,
        ),
    )(emb, lens, img, h0p,
      params["w_ih_t"], params["w_hh_t"], params["b_i"], params["b_hn"],
      params["w_hid"], params["w_img"], params["b_out"])

    return out[:B, :O]


# ----------------------------------------------------------------------------
# Pure-JAX f32 reference of the same forward pass (correctness cross-check)
# ----------------------------------------------------------------------------
def rnn_model_reference(tp, questions, images, question_lengths, h0):
    B, S = questions.shape
    emb = jnp.take(tp["embedding"], questions, axis=0)           # (B, S, H)

    def step(h, x):
        gi = x @ tp["w_ih"].T + tp["b_ih"]
        gh = h @ tp["w_hh"].T + tp["b_hh"]
        ir, iz, inn = jnp.split(gi, 3, axis=1)
        hr, hz, hn = jnp.split(gh, 3, axis=1)
        r = jax.nn.sigmoid(ir + hr)
        z = jax.nn.sigmoid(iz + hz)
        n = jnp.tanh(inn + r * hn)
        h = (1.0 - z) * n + z * h
        return h, h

    _, encs = jax.lax.scan(step, h0, jnp.transpose(emb, (1, 0, 2)))  # (S, B, H)
    lens = jnp.clip(question_lengths, 0, S - 1)
    last = encs[lens, jnp.arange(B), :]
    qv = jnp.concatenate([last, images], axis=1)
    logits = qv @ tp["w_out"].T + tp["b_out"]
    return jax.nn.log_softmax(logits, axis=1)


if __name__ == "__main__":
    vocab_size = 20
    image_size = 16
    hidden_size = 32
    output_size = 10
    batch = 2
    seq = 8

    key = jax.random.PRNGKey(0)
    k_param, k_q, k_img, k_h0 = jax.random.split(key, 4)

    tp = init_torch_params(k_param, vocab_size, image_size, hidden_size,
                           output_size)
    params = prepare_pallas_params(tp, vocab_size, image_size, hidden_size,
                                   output_size)

    questions = jax.random.randint(k_q, (batch, seq), 0, vocab_size + 1,
                                   dtype=jnp.int32)
    images = jax.random.normal(k_img, (batch, image_size), jnp.float32)
    question_lengths = jnp.array([5, 7], dtype=jnp.int32)
    # torch.normal(zeros, 0.01*ones) initial GRU state, deterministic here.
    h0 = jax.random.normal(k_h0, (batch, hidden_size), jnp.float32) * 0.01

    answers = rnn_model_forward(params, questions, images, question_lengths, h0)
    answers = jax.block_until_ready(answers)

    assert answers.shape == (batch, output_size)
    assert bool(jnp.all(jnp.isfinite(answers)))

    # bf16 MXU operands (f32 accumulation / gate math) vs pure-f32 reference:
    # slightly relaxed tolerance.
    ref = rnn_model_reference(tp, questions, images, question_lengths, h0)
    assert bool(jnp.allclose(answers, ref, atol=4e-2, rtol=4e-2)), (
        "max abs diff = %s" % float(jnp.max(jnp.abs(answers - ref))))

    print("KERNEL_OK")
</pallas_src>

<mosaic_0001>
module attributes {stable_mosaic.version = 11 : i64} {
  func.func @_rnn_fused_kernel(%arg0: i32, %arg1: i32, %arg2: memref<8x8x128xbf16, #tpu.memory_space<vmem>>, %arg3: memref<8x1xi32, #tpu.memory_space<vmem>>, %arg4: memref<8x128xbf16, #tpu.memory_space<vmem>>, %arg5: memref<8x128xf32, #tpu.memory_space<vmem>>, %arg6: memref<128x384xbf16, #tpu.memory_space<vmem>>, %arg7: memref<128x384xbf16, #tpu.memory_space<vmem>>, %arg8: memref<1x384xf32, #tpu.memory_space<vmem>>, %arg9: memref<1x128xf32, #tpu.memory_space<vmem>>, %arg10: memref<128x128xbf16, #tpu.memory_space<vmem>>, %arg11: memref<128x128xbf16, #tpu.memory_space<vmem>>, %arg12: memref<1x128xf32, #tpu.memory_space<vmem>>, %arg13: memref<8x128xf32, #tpu.memory_space<vmem>>, %arg14: memref<64x384xf32, #tpu.memory_space<vmem>>, %arg15: memref<8x128xf32, #tpu.memory_space<vmem>>, %arg16: memref<8x128xf32, #tpu.memory_space<vmem>>) attributes {dimension_semantics = [#tpu.dimension_semantics<parallel>, #tpu.dimension_semantics<arbitrary>], iteration_bounds = array<i64: 1, 1>, scalar_prefetch = 0 : i64, scratch_operands = 3 : i64, tpu.core_type = #tpu.core_type<tc>, window_params = [{transform_indices = @transform_0, window_bounds = array<i64: 8, 8, 128>}, {transform_indices = @transform_1, window_bounds = array<i64: 8, 1>}, {transform_indices = @transform_2, window_bounds = array<i64: 8, 128>}, {transform_indices = @transform_3, window_bounds = array<i64: 8, 128>}, {pipeline_mode = #tpu.pipeline_mode<synchronous>, transform_indices = @transform_4, window_bounds = array<i64: 128, 384>}, {pipeline_mode = #tpu.pipeline_mode<synchronous>, transform_indices = @transform_5, window_bounds = array<i64: 128, 384>}, {pipeline_mode = #tpu.pipeline_mode<synchronous>, transform_indices = @transform_6, window_bounds = array<i64: 1, 384>}, {pipeline_mode = #tpu.pipeline_mode<synchronous>, transform_indices = @transform_7, window_bounds = array<i64: 1, 128>}, {pipeline_mode = #tpu.pipeline_mode<synchronous>, transform_indices = @transform_8, window_bounds = array<i64: 128, 128>}, {pipeline_mode = #tpu.pipeline_mode<synchronous>, transform_indices = @transform_9, window_bounds = array<i64: 128, 128>}, {pipeline_mode = #tpu.pipeline_mode<synchronous>, transform_indices = @transform_10, window_bounds = array<i64: 1, 128>}, {transform_indices = @transform_11, window_bounds = array<i64: 8, 128>}]} {
    %c0_i32 = arith.constant 0 : i32
    %0 = arith.cmpi eq, %arg1, %c0_i32 : i32
    %1 = arith.extui %0 : i1 to i32
    %c0_i32_0 = arith.constant 0 : i32
    %2 = arith.cmpi ne, %1, %c0_i32_0 : i32
    scf.if %2 {
      %c0_81 = arith.constant 0 : index
      %c0_82 = arith.constant 0 : index
      %325 = vector.load %arg5[%c0_81, %c0_82] : memref<8x128xf32, #tpu.memory_space<vmem>>, vector<8x128xf32>
      %c0_83 = arith.constant 0 : index
      %c0_84 = arith.constant 0 : index
      %326 = vector.load %arg15[%c0_83, %c0_84] : memref<8x128xf32, #tpu.memory_space<vmem>>, vector<8x128xf32>
      tpu.vector_store %arg15[%c0_83, %c0_84], %325 {strides = array<i32>} : memref<8x128xf32, #tpu.memory_space<vmem>>, vector<8x128xf32>,
      %c0_85 = arith.constant 0 : index
      %c0_86 = arith.constant 0 : index
      %327 = vector.load %arg5[%c0_85, %c0_86] : memref<8x128xf32, #tpu.memory_space<vmem>>, vector<8x128xf32>
      %c0_87 = arith.constant 0 : index
      %c0_88 = arith.constant 0 : index
      %328 = vector.load %arg16[%c0_87, %c0_88] : memref<8x128xf32, #tpu.memory_space<vmem>>, vector<8x128xf32>
      tpu.vector_store %arg16[%c0_87, %c0_88], %327 {strides = array<i32>} : memref<8x128xf32, #tpu.memory_space<vmem>>, vector<8x128xf32>,
    } else {
    }
    %c0 = arith.constant 0 : index
    %c0_1 = arith.constant 0 : index
    %c0_2 = arith.constant 0 : index
    %3 = vector.load %arg2[%c0, %c0_1, %c0_2] : memref<8x8x128xbf16, #tpu.memory_space<vmem>>, vector<8x8x128xbf16>
    %4 = vector.shape_cast %3 : vector<8x8x128xbf16> to vector<64x128xbf16>
    %c0_3 = arith.constant 0 : index
    %c0_4 = arith.constant 0 : index
    %5 = vector.load %arg6[%c0_3, %c0_4] : memref<128x384xbf16, #tpu.memory_space<vmem>>, vector<128x384xbf16>
    %cst = arith.constant dense<0.000000e+00> : vector<64x384xf32>
    %6 = tpu.matmul %4, %5, %cst {dimension_numbers = #tpu.dot_dimension_numbers<[1], [0], [0], [1], [0, 0, 1, 1], [], []>} : vector<64x128xbf16>, vector<128x384xbf16>, vector<64x384xf32> -> vector<64x384xf32>
    %c0_5 = arith.constant 0 : index
    %c0_6 = arith.constant 0 : index
    %7 = vector.load %arg8[%c0_5, %c0_6] : memref<1x384xf32, #tpu.memory_space<vmem>>, vector<1x384xf32>
    %8 = vector.broadcast %7 : vector<1x384xf32> to vector<64x384xf32>
    %9 = arith.addf %6, %8 : vector<64x384xf32>
    %c0_7 = arith.constant 0 : index
    %c0_8 = arith.constant 0 : index
    %10 = vector.load %arg14[%c0_7, %c0_8] : memref<64x384xf32, #tpu.memory_space<vmem>>, vector<64x384xf32>
    tpu.vector_store %arg14[%c0_7, %c0_8], %9 {strides = array<i32>} : memref<64x384xf32, #tpu.memory_space<vmem>>, vector<64x384xf32>,
    %c0_9 = arith.constant 0 : index
    %c0_10 = arith.constant 0 : index
    %11 = vector.load %arg9[%c0_9, %c0_10] : memref<1x128xf32, #tpu.memory_space<vmem>>, vector<1x128xf32>
    %c0_11 = arith.constant 0 : index
    %c0_12 = arith.constant 0 : index
    %12 = vector.load %arg3[%c0_11, %c0_12] : memref<8x1xi32, #tpu.memory_space<vmem>>, vector<8x1xi32>
    %c8_i32 = arith.constant 8 : i32
    %13 = arith.muli %arg1, %c8_i32 : i32
    %c0_13 = arith.constant 0 : index
    %c0_14 = arith.constant 0 : index
    %14 = vector.load %arg15[%c0_13, %c0_14] : memref<8x128xf32, #tpu.memory_space<vmem>>, vector<8x128xf32>
    %c0_15 = arith.constant 0 : index
    %c0_16 = arith.constant 0 : index
    %15 = vector.load %arg16[%c0_15, %c0_16] : memref<8x128xf32, #tpu.memory_space<vmem>>, vector<8x128xf32>
    %c0_17 = arith.constant 0 : index
    %c0_18 = arith.constant 0 : index
    %16 = vector.load %arg14[%c0_17, %c0_18] : memref<64x384xf32, #tpu.memory_space<vmem>>, vector<8x384xf32>
    %17 = arith.truncf %14 : vector<8x128xf32> to vector<8x128xbf16>
    %c0_19 = arith.constant 0 : index
    %c0_20 = arith.constant 0 : index
    %18 = vector.load %arg7[%c0_19, %c0_20] : memref<128x384xbf16, #tpu.memory_space<vmem>>, vector<128x384xbf16>
    %cst_21 = arith.constant dense<0.000000e+00> : vector<8x384xf32>
    %19 = tpu.matmul %17, %18, %cst_21 {dimension_numbers = #tpu.dot_dimension_numbers<[1], [0], [0], [1], [0, 0, 1, 1], [], []>} : vector<8x128xbf16>, vector<128x384xbf16>, vector<8x384xf32> -> vector<8x384xf32>
    %20 = vector.extract_strided_slice %16 {offsets = [0, 0], sizes = [8, 128], strides = [1, 1]} : vector<8x384xf32> to vector<8x128xf32>
    %21 = vector.extract_strided_slice %19 {offsets = [0, 0], sizes = [8, 128], strides = [1, 1]} : vector<8x384xf32> to vector<8x128xf32>
    %22 = arith.addf %20, %21 : vector<8x128xf32>
    %23 = arith.negf %22 : vector<8x128xf32>
    %24 = math.exp %23 : vector<8x128xf32>
    %cst_22 = arith.constant 1.000000e+00 : f32
    %25 = vector.broadcast %cst_22 : f32 to vector<8x128xf32>
    %26 = arith.addf %25, %24 : vector<8x128xf32>
    %27 = arith.divf %25, %26 : vector<8x128xf32>
    %28 = vector.extract_strided_slice %16 {offsets = [0, 128], sizes = [8, 128], strides = [1, 1]} : vector<8x384xf32> to vector<8x128xf32>
    %29 = vector.extract_strided_slice %19 {offsets = [0, 128], sizes = [8, 128], strides = [1, 1]} : vector<8x384xf32> to vector<8x128xf32>
    %30 = arith.addf %28, %29 : vector<8x128xf32>
    %31 = arith.negf %30 : vector<8x128xf32>
    %32 = math.exp %31 : vector<8x128xf32>
    %cst_23 = arith.constant 1.000000e+00 : f32
    %33 = vector.broadcast %cst_23 : f32 to vector<8x128xf32>
    %34 = arith.addf %33, %32 : vector<8x128xf32>
    %35 = arith.divf %33, %34 : vector<8x128xf32>
    %36 = vector.extract_strided_slice %16 {offsets = [0, 256], sizes = [8, 128], strides = [1, 1]} : vector<8x384xf32> to vector<8x128xf32>
    %37 = vector.extract_strided_slice %19 {offsets = [0, 256], sizes = [8, 128], strides = [1, 1]} : vector<8x384xf32> to vector<8x128xf32>
    %38 = vector.broadcast %11 : vector<1x128xf32> to vector<8x128xf32>
    %39 = arith.addf %37, %38 : vector<8x128xf32>
    %40 = arith.mulf %27, %39 : vector<8x128xf32>
    %41 = arith.addf %36, %40 : vector<8x128xf32>
    %42 = math.tanh %41 : vector<8x128xf32>
    %cst_24 = arith.constant 1.000000e+00 : f32
    %43 = vector.broadcast %cst_24 : f32 to vector<8x128xf32>
    %44 = arith.subf %43, %35 : vector<8x128xf32>
    %45 = arith.mulf %44, %42 : vector<8x128xf32>
    %46 = arith.mulf %35, %14 : vector<8x128xf32>
    %47 = arith.addf %45, %46 : vector<8x128xf32>
    %c0_i32_25 = arith.constant 0 : i32
    %48 = arith.addi %13, %c0_i32_25 : i32
    %49 = vector.broadcast %48 : i32 to vector<8x1xi32>
    %50 = arith.cmpi eq, %12, %49 : vector<8x1xi32>
    %51 = vector.shape_cast %50 : vector<8x1xi1> to vector<8x1xi1>
    %52 = vector.broadcast %51 : vector<8x1xi1> to vector<8x128xi1>
    %53 = arith.select %52, %47, %15 : vector<8x128xi1>, vector<8x128xf32>
    %c8 = arith.constant 8 : index
    %c0_26 = arith.constant 0 : index
    %54 = vector.load %arg14[%c8, %c0_26] : memref<64x384xf32, #tpu.memory_space<vmem>>, vector<8x384xf32>
    %55 = arith.truncf %47 : vector<8x128xf32> to vector<8x128xbf16>
    %c0_27 = arith.constant 0 : index
    %c0_28 = arith.constant 0 : index
    %56 = vector.load %arg7[%c0_27, %c0_28] : memref<128x384xbf16, #tpu.memory_space<vmem>>, vector<128x384xbf16>
    %cst_29 = arith.constant dense<0.000000e+00> : vector<8x384xf32>
    %57 = tpu.matmul %55, %56, %cst_29 {dimension_numbers = #tpu.dot_dimension_numbers<[1], [0], [0], [1], [0, 0, 1, 1], [], []>} : vector<8x128xbf16>, vector<128x384xbf16>, vector<8x384xf32> -> vector<8x384xf32>
    %58 = vector.extract_strided_slice %54 {offsets = [0, 0], sizes = [8, 128], strides = [1, 1]} : vector<8x384xf32> to vector<8x128xf32>
    %59 = vector.extract_strided_slice %57 {offsets = [0, 0], sizes = [8, 128], strides = [1, 1]} : vector<8x384xf32> to vector<8x128xf32>
    %60 = arith.addf %58, %59 : vector<8x128xf32>
    %61 = arith.negf %60 : vector<8x128xf32>
    %62 = math.exp %61 : vector<8x128xf32>
    %cst_30 = arith.constant 1.000000e+00 : f32
    %63 = vector.broadcast %cst_30 : f32 to vector<8x128xf32>
    %64 = arith.addf %63, %62 : vector<8x128xf32>
    %65 = arith.divf %63, %64 : vector<8x128xf32>
    %66 = vector.extract_strided_slice %54 {offsets = [0, 128], sizes = [8, 128], strides = [1, 1]} : vector<8x384xf32> to vector<8x128xf32>
    %67 = vector.extract_strided_slice %57 {offsets = [0, 128], sizes = [8, 128], strides = [1, 1]} : vector<8x384xf32> to vector<8x128xf32>
    %68 = arith.addf %66, %67 : vector<8x128xf32>
    %69 = arith.negf %68 : vector<8x128xf32>
    %70 = math.exp %69 : vector<8x128xf32>
    %cst_31 = arith.constant 1.000000e+00 : f32
    %71 = vector.broadcast %cst_31 : f32 to vector<8x128xf32>
    %72 = arith.addf %71, %70 : vector<8x128xf32>
    %73 = arith.divf %71, %72 : vector<8x128xf32>
    %74 = vector.extract_strided_slice %54 {offsets = [0, 256], sizes = [8, 128], strides = [1, 1]} : vector<8x384xf32> to vector<8x128xf32>
    %75 = vector.extract_strided_slice %57 {offsets = [0, 256], sizes = [8, 128], strides = [1, 1]} : vector<8x384xf32> to vector<8x128xf32>
    %76 = vector.broadcast %11 : vector<1x128xf32> to vector<8x128xf32>
    %77 = arith.addf %75, %76 : vector<8x128xf32>
    %78 = arith.mulf %65, %77 : vector<8x128xf32>
    %79 = arith.addf %74, %78 : vector<8x128xf32>
    %80 = math.tanh %79 : vector<8x128xf32>
    %cst_32 = arith.constant 1.000000e+00 : f32
    %81 = vector.broadcast %cst_32 : f32 to vector<8x128xf32>
    %82 = arith.subf %81, %73 : vector<8x128xf32>
    %83 = arith.mulf %82, %80 : vector<8x128xf32>
    %84 = arith.mulf %73, %47 : vector<8x128xf32>
    %85 = arith.addf %83, %84 : vector<8x128xf32>
    %c1_i32 = arith.constant 1 : i32
    %86 = arith.addi %13, %c1_i32 : i32
    %87 = vector.broadcast %86 : i32 to vector<8x1xi32>
    %88 = arith.cmpi eq, %12, %87 : vector<8x1xi32>
    %89 = vector.shape_cast %88 : vector<8x1xi1> to vector<8x1xi1>
    %90 = vector.broadcast %89 : vector<8x1xi1> to vector<8x128xi1>
    %91 = arith.select %90, %85, %53 : vector<8x128xi1>, vector<8x128xf32>
    %c16 = arith.constant 16 : index
    %c0_33 = arith.constant 0 : index
    %92 = vector.load %arg14[%c16, %c0_33] : memref<64x384xf32, #tpu.memory_space<vmem>>, vector<8x384xf32>
    %93 = arith.truncf %85 : vector<8x128xf32> to vector<8x128xbf16>
    %c0_34 = arith.constant 0 : index
    %c0_35 = arith.constant 0 : index
    %94 = vector.load %arg7[%c0_34, %c0_35] : memref<128x384xbf16, #tpu.memory_space<vmem>>, vector<128x384xbf16>
    %cst_36 = arith.constant dense<0.000000e+00> : vector<8x384xf32>
    %95 = tpu.matmul %93, %94, %cst_36 {dimension_numbers = #tpu.dot_dimension_numbers<[1], [0], [0], [1], [0, 0, 1, 1], [], []>} : vector<8x128xbf16>, vector<128x384xbf16>, vector<8x384xf32> -> vector<8x384xf32>
    %96 = vector.extract_strided_slice %92 {offsets = [0, 0], sizes = [8, 128], strides = [1, 1]} : vector<8x384xf32> to vector<8x128xf32>
    %97 = vector.extract_strided_slice %95 {offsets = [0, 0], sizes = [8, 128], strides = [1, 1]} : vector<8x384xf32> to vector<8x128xf32>
    %98 = arith.addf %96, %97 : vector<8x128xf32>
    %99 = arith.negf %98 : vector<8x128xf32>
    %100 = math.exp %99 : vector<8x128xf32>
    %cst_37 = arith.constant 1.000000e+00 : f32
    %101 = vector.broadcast %cst_37 : f32 to vector<8x128xf32>
    %102 = arith.addf %101, %100 : vector<8x128xf32>
    %103 = arith.divf %101, %102 : vector<8x128xf32>
    %104 = vector.extract_strided_slice %92 {offsets = [0, 128], sizes = [8, 128], strides = [1, 1]} : vector<8x384xf32> to vector<8x128xf32>
    %105 = vector.extract_strided_slice %95 {offsets = [0, 128], sizes = [8, 128], strides = [1, 1]} : vector<8x384xf32> to vector<8x128xf32>
    %106 = arith.addf %104, %105 : vector<8x128xf32>
    %107 = arith.negf %106 : vector<8x128xf32>
    %108 = math.exp %107 : vector<8x128xf32>
    %cst_38 = arith.constant 1.000000e+00 : f32
    %109 = vector.broadcast %cst_38 : f32 to vector<8x128xf32>
    %110 = arith.addf %109, %108 : vector<8x128xf32>
    %111 = arith.divf %109, %110 : vector<8x128xf32>
    %112 = vector.extract_strided_slice %92 {offsets = [0, 256], sizes = [8, 128], strides = [1, 1]} : vector<8x384xf32> to vector<8x128xf32>
    %113 = vector.extract_strided_slice %95 {offsets = [0, 256], sizes = [8, 128], strides = [1, 1]} : vector<8x384xf32> to vector<8x128xf32>
    %114 = vector.broadcast %11 : vector<1x128xf32> to vector<8x128xf32>
    %115 = arith.addf %113, %114 : vector<8x128xf32>
    %116 = arith.mulf %103, %115 : vector<8x128xf32>
    %117 = arith.addf %112, %116 : vector<8x128xf32>
    %118 = math.tanh %117 : vector<8x128xf32>
    %cst_39 = arith.constant 1.000000e+00 : f32
    %119 = vector.broadcast %cst_39 : f32 to vector<8x128xf32>
    %120 = arith.subf %119, %111 : vector<8x128xf32>
    %121 = arith.mulf %120, %118 : vector<8x128xf32>
    %122 = arith.mulf %111, %85 : vector<8x128xf32>
    %123 = arith.addf %121, %122 : vector<8x128xf32>
    %c2_i32 = arith.constant 2 : i32
    %124 = arith.addi %13, %c2_i32 : i32
    %125 = vector.broadcast %124 : i32 to vector<8x1xi32>
    %126 = arith.cmpi eq, %12, %125 : vector<8x1xi32>
    %127 = vector.shape_cast %126 : vector<8x1xi1> to vector<8x1xi1>
    %128 = vector.broadcast %127 : vector<8x1xi1> to vector<8x128xi1>
    %129 = arith.select %128, %123, %91 : vector<8x128xi1>, vector<8x128xf32>
    %c24 = arith.constant 24 : index
    %c0_40 = arith.constant 0 : index
    %130 = vector.load %arg14[%c24, %c0_40] : memref<64x384xf32, #tpu.memory_space<vmem>>, vector<8x384xf32>
    %131 = arith.truncf %123 : vector<8x128xf32> to vector<8x128xbf16>
    %c0_41 = arith.constant 0 : index
    %c0_42 = arith.constant 0 : index
    %132 = vector.load %arg7[%c0_41, %c0_42] : memref<128x384xbf16, #tpu.memory_space<vmem>>, vector<128x384xbf16>
    %cst_43 = arith.constant dense<0.000000e+00> : vector<8x384xf32>
    %133 = tpu.matmul %131, %132, %cst_43 {dimension_numbers = #tpu.dot_dimension_numbers<[1], [0], [0], [1], [0, 0, 1, 1], [], []>} : vector<8x128xbf16>, vector<128x384xbf16>, vector<8x384xf32> -> vector<8x384xf32>
    %134 = vector.extract_strided_slice %130 {offsets = [0, 0], sizes = [8, 128], strides = [1, 1]} : vector<8x384xf32> to vector<8x128xf32>
    %135 = vector.extract_strided_slice %133 {offsets = [0, 0], sizes = [8, 128], strides = [1, 1]} : vector<8x384xf32> to vector<8x128xf32>
    %136 = arith.addf %134, %135 : vector<8x128xf32>
    %137 = arith.negf %136 : vector<8x128xf32>
    %138 = math.exp %137 : vector<8x128xf32>
    %cst_44 = arith.constant 1.000000e+00 : f32
    %139 = vector.broadcast %cst_44 : f32 to vector<8x128xf32>
    %140 = arith.addf %139, %138 : vector<8x128xf32>
    %141 = arith.divf %139, %140 : vector<8x128xf32>
    %142 = vector.extract_strided_slice %130 {offsets = [0, 128], sizes = [8, 128], strides = [1, 1]} : vector<8x384xf32> to vector<8x128xf32>
    %143 = vector.extract_strided_slice %133 {offsets = [0, 128], sizes = [8, 128], strides = [1, 1]} : vector<8x384xf32> to vector<8x128xf32>
    %144 = arith.addf %142, %143 : vector<8x128xf32>
    %145 = arith.negf %144 : vector<8x128xf32>
    %146 = math.exp %145 : vector<8x128xf32>
    %cst_45 = arith.constant 1.000000e+00 : f32
    %147 = vector.broadcast %cst_45 : f32 to vector<8x128xf32>
    %148 = arith.addf %147, %146 : vector<8x128xf32>
    %149 = arith.divf %147, %148 : vector<8x128xf32>
    %150 = vector.extract_strided_slice %130 {offsets = [0, 256], sizes = [8, 128], strides = [1, 1]} : vector<8x384xf32> to vector<8x128xf32>
    %151 = vector.extract_strided_slice %133 {offsets = [0, 256], sizes = [8, 128], strides = [1, 1]} : vector<8x384xf32> to vector<8x128xf32>
    %152 = vector.broadcast %11 : vector<1x128xf32> to vector<8x128xf32>
    %153 = arith.addf %151, %152 : vector<8x128xf32>
    %154 = arith.mulf %141, %153 : vector<8x128xf32>
    %155 = arith.addf %150, %154 : vector<8x128xf32>
    %156 = math.tanh %155 : vector<8x128xf32>
    %cst_46 = arith.constant 1.000000e+00 : f32
    %157 = vector.broadcast %cst_46 : f32 to vector<8x128xf32>
    %158 = arith.subf %157, %149 : vector<8x128xf32>
    %159 = arith.mulf %158, %156 : vector<8x128xf32>
    %160 = arith.mulf %149, %123 : vector<8x128xf32>
    %161 = arith.addf %159, %160 : vector<8x128xf32>
    %c3_i32 = arith.constant 3 : i32
    %162 = arith.addi %13, %c3_i32 : i32
    %163 = vector.broadcast %162 : i32 to vector<8x1xi32>
    %164 = arith.cmpi eq, %12, %163 : vector<8x1xi32>
    %165 = vector.shape_cast %164 : vector<8x1xi1> to vector<8x1xi1>
    %166 = vector.broadcast %165 : vector<8x1xi1> to vector<8x128xi1>
    %167 = arith.select %166, %161, %129 : vector<8x128xi1>, vector<8x128xf32>
    %c32 = arith.constant 32 : index
    %c0_47 = arith.constant 0 : index
    %168 = vector.load %arg14[%c32, %c0_47] : memref<64x384xf32, #tpu.memory_space<vmem>>, vector<8x384xf32>
    %169 = arith.truncf %161 : vector<8x128xf32> to vector<8x128xbf16>
    %c0_48 = arith.constant 0 : index
    %c0_49 = arith.constant 0 : index
    %170 = vector.load %arg7[%c0_48, %c0_49] : memref<128x384xbf16, #tpu.memory_space<vmem>>, vector<128x384xbf16>
    %cst_50 = arith.constant dense<0.000000e+00> : vector<8x384xf32>
    %171 = tpu.matmul %169, %170, %cst_50 {dimension_numbers = #tpu.dot_dimension_numbers<[1], [0], [0], [1], [0, 0, 1, 1], [], []>} : vector<8x128xbf16>, vector<128x384xbf16>, vector<8x384xf32> -> vector<8x384xf32>
    %172 = vector.extract_strided_slice %168 {offsets = [0, 0], sizes = [8, 128], strides = [1, 1]} : vector<8x384xf32> to vector<8x128xf32>
    %173 = vector.extract_strided_slice %171 {offsets = [0, 0], sizes = [8, 128], strides = [1, 1]} : vector<8x384xf32> to vector<8x128xf32>
    %174 = arith.addf %172, %173 : vector<8x128xf32>
    %175 = arith.negf %174 : vector<8x128xf32>
    %176 = math.exp %175 : vector<8x128xf32>
    %cst_51 = arith.constant 1.000000e+00 : f32
    %177 = vector.broadcast %cst_51 : f32 to vector<8x128xf32>
    %178 = arith.addf %177, %176 : vector<8x128xf32>
    %179 = arith.divf %177, %178 : vector<8x128xf32>
    %180 = vector.extract_strided_slice %168 {offsets = [0, 128], sizes = [8, 128], strides = [1, 1]} : vector<8x384xf32> to vector<8x128xf32>
    %181 = vector.extract_strided_slice %171 {offsets = [0, 128], sizes = [8, 128], strides = [1, 1]} : vector<8x384xf32> to vector<8x128xf32>
    %182 = arith.addf %180, %181 : vector<8x128xf32>
    %183 = arith.negf %182 : vector<8x128xf32>
    %184 = math.exp %183 : vector<8x128xf32>
    %cst_52 = arith.constant 1.000000e+00 : f32
    %185 = vector.broadcast %cst_52 : f32 to vector<8x128xf32>
    %186 = arith.addf %185, %184 : vector<8x128xf32>
    %187 = arith.divf %185, %186 : vector<8x128xf32>
    %188 = vector.extract_strided_slice %168 {offsets = [0, 256], sizes = [8, 128], strides = [1, 1]} : vector<8x384xf32> to vector<8x128xf32>
    %189 = vector.extract_strided_slice %171 {offsets = [0, 256], sizes = [8, 128], strides = [1, 1]} : vector<8x384xf32> to vector<8x128xf32>
    %190 = vector.broadcast %11 : vector<1x128xf32> to vector<8x128xf32>
    %191 = arith.addf %189, %190 : vector<8x128xf32>
    %192 = arith.mulf %179, %191 : vector<8x128xf32>
    %193 = arith.addf %188, %192 : vector<8x128xf32>
    %194 = math.tanh %193 : vector<8x128xf32>
    %cst_53 = arith.constant 1.000000e+00 : f32
    %195 = vector.broadcast %cst_53 : f32 to vector<8x128xf32>
    %196 = arith.subf %195, %187 : vector<8x128xf32>
    %197 = arith.mulf %196, %194 : vector<8x128xf32>
    %198 = arith.mulf %187, %161 : vector<8x128xf32>
    %199 = arith.addf %197, %198 : vector<8x128xf32>
    %c4_i32 = arith.constant 4 : i32
    %200 = arith.addi %13, %c4_i32 : i32
    %201 = vector.broadcast %200 : i32 to vector<8x1xi32>
    %202 = arith.cmpi eq, %12, %201 : vector<8x1xi32>
    %203 = vector.shape_cast %202 : vector<8x1xi1> to vector<8x1xi1>
    %204 = vector.broadcast %203 : vector<8x1xi1> to vector<8x128xi1>
    %205 = arith.select %204, %199, %167 : vector<8x128xi1>, vector<8x128xf32>
    %c40 = arith.constant 40 : index
    %c0_54 = arith.constant 0 : index
    %206 = vector.load %arg14[%c40, %c0_54] : memref<64x384xf32, #tpu.memory_space<vmem>>, vector<8x384xf32>
    %207 = arith.truncf %199 : vector<8x128xf32> to vector<8x128xbf16>
    %c0_55 = arith.constant 0 : index
    %c0_56 = arith.constant 0 : index
    %208 = vector.load %arg7[%c0_55, %c0_56] : memref<128x384xbf16, #tpu.memory_space<vmem>>, vector<128x384xbf16>
    %cst_57 = arith.constant dense<0.000000e+00> : vector<8x384xf32>
    %209 = tpu.matmul %207, %208, %cst_57 {dimension_numbers = #tpu.dot_dimension_numbers<[1], [0], [0], [1], [0, 0, 1, 1], [], []>} : vector<8x128xbf16>, vector<128x384xbf16>, vector<8x384xf32> -> vector<8x384xf32>
    %210 = vector.extract_strided_slice %206 {offsets = [0, 0], sizes = [8, 128], strides = [1, 1]} : vector<8x384xf32> to vector<8x128xf32>
    %211 = vector.extract_strided_slice %209 {offsets = [0, 0], sizes = [8, 128], strides = [1, 1]} : vector<8x384xf32> to vector<8x128xf32>
    %212 = arith.addf %210, %211 : vector<8x128xf32>
    %213 = arith.negf %212 : vector<8x128xf32>
    %214 = math.exp %213 : vector<8x128xf32>
    %cst_58 = arith.constant 1.000000e+00 : f32
    %215 = vector.broadcast %cst_58 : f32 to vector<8x128xf32>
    %216 = arith.addf %215, %214 : vector<8x128xf32>
    %217 = arith.divf %215, %216 : vector<8x128xf32>
    %218 = vector.extract_strided_slice %206 {offsets = [0, 128], sizes = [8, 128], strides = [1, 1]} : vector<8x384xf32> to vector<8x128xf32>
    %219 = vector.extract_strided_slice %209 {offsets = [0, 128], sizes = [8, 128], strides = [1, 1]} : vector<8x384xf32> to vector<8x128xf32>
    %220 = arith.addf %218, %219 : vector<8x128xf32>
    %221 = arith.negf %220 : vector<8x128xf32>
    %222 = math.exp %221 : vector<8x128xf32>
    %cst_59 = arith.constant 1.000000e+00 : f32
    %223 = vector.broadcast %cst_59 : f32 to vector<8x128xf32>
    %224 = arith.addf %223, %222 : vector<8x128xf32>
    %225 = arith.divf %223, %224 : vector<8x128xf32>
    %226 = vector.extract_strided_slice %206 {offsets = [0, 256], sizes = [8, 128], strides = [1, 1]} : vector<8x384xf32> to vector<8x128xf32>
    %227 = vector.extract_strided_slice %209 {offsets = [0, 256], sizes = [8, 128], strides = [1, 1]} : vector<8x384xf32> to vector<8x128xf32>
    %228 = vector.broadcast %11 : vector<1x128xf32> to vector<8x128xf32>
    %229 = arith.addf %227, %228 : vector<8x128xf32>
    %230 = arith.mulf %217, %229 : vector<8x128xf32>
    %231 = arith.addf %226, %230 : vector<8x128xf32>
    %232 = math.tanh %231 : vector<8x128xf32>
    %cst_60 = arith.constant 1.000000e+00 : f32
    %233 = vector.broadcast %cst_60 : f32 to vector<8x128xf32>
    %234 = arith.subf %233, %225 : vector<8x128xf32>
    %235 = arith.mulf %234, %232 : vector<8x128xf32>
    %236 = arith.mulf %225, %199 : vector<8x128xf32>
    %237 = arith.addf %235, %236 : vector<8x128xf32>
    %c5_i32 = arith.constant 5 : i32
    %238 = arith.addi %13, %c5_i32 : i32
    %239 = vector.broadcast %238 : i32 to vector<8x1xi32>
    %240 = arith.cmpi eq, %12, %239 : vector<8x1xi32>
    %241 = vector.shape_cast %240 : vector<8x1xi1> to vector<8x1xi1>
    %242 = vector.broadcast %241 : vector<8x1xi1> to vector<8x128xi1>
    %243 = arith.select %242, %237, %205 : vector<8x128xi1>, vector<8x128xf32>
    %c48 = arith.constant 48 : index
    %c0_61 = arith.constant 0 : index
    %244 = vector.load %arg14[%c48, %c0_61] : memref<64x384xf32, #tpu.memory_space<vmem>>, vector<8x384xf32>
    %245 = arith.truncf %237 : vector<8x128xf32> to vector<8x128xbf16>
    %c0_62 = arith.constant 0 : index
    %c0_63 = arith.constant 0 : index
    %246 = vector.load %arg7[%c0_62, %c0_63] : memref<128x384xbf16, #tpu.memory_space<vmem>>, vector<128x384xbf16>
    %cst_64 = arith.constant dense<0.000000e+00> : vector<8x384xf32>
    %247 = tpu.matmul %245, %246, %cst_64 {dimension_numbers = #tpu.dot_dimension_numbers<[1], [0], [0], [1], [0, 0, 1, 1], [], []>} : vector<8x128xbf16>, vector<128x384xbf16>, vector<8x384xf32> -> vector<8x384xf32>
    %248 = vector.extract_strided_slice %244 {offsets = [0, 0], sizes = [8, 128], strides = [1, 1]} : vector<8x384xf32> to vector<8x128xf32>
    %249 = vector.extract_strided_slice %247 {offsets = [0, 0], sizes = [8, 128], strides = [1, 1]} : vector<8x384xf32> to vector<8x128xf32>
    %250 = arith.addf %248, %249 : vector<8x128xf32>
    %251 = arith.negf %250 : vector<8x128xf32>
    %252 = math.exp %251 : vector<8x128xf32>
    %cst_65 = arith.constant 1.000000e+00 : f32
    %253 = vector.broadcast %cst_65 : f32 to vector<8x128xf32>
    %254 = arith.addf %253, %252 : vector<8x128xf32>
    %255 = arith.divf %253, %254 : vector<8x128xf32>
    %256 = vector.extract_strided_slice %244 {offsets = [0, 128], sizes = [8, 128], strides = [1, 1]} : vector<8x384xf32> to vector<8x128xf32>
    %257 = vector.extract_strided_slice %247 {offsets = [0, 128], sizes = [8, 128], strides = [1, 1]} : vector<8x384xf32> to vector<8x128xf32>
    %258 = arith.addf %256, %257 : vector<8x128xf32>
    %259 = arith.negf %258 : vector<8x128xf32>
    %260 = math.exp %259 : vector<8x128xf32>
    %cst_66 = arith.constant 1.000000e+00 : f32
    %261 = vector.broadcast %cst_66 : f32 to vector<8x128xf32>
    %262 = arith.addf %261, %260 : vector<8x128xf32>
    %263 = arith.divf %261, %262 : vector<8x128xf32>
    %264 = vector.extract_strided_slice %244 {offsets = [0, 256], sizes = [8, 128], strides = [1, 1]} : vector<8x384xf32> to vector<8x128xf32>
    %265 = vector.extract_strided_slice %247 {offsets = [0, 256], sizes = [8, 128], strides = [1, 1]} : vector<8x384xf32> to vector<8x128xf32>
    %266 = vector.broadcast %11 : vector<1x128xf32> to vector<8x128xf32>
    %267 = arith.addf %265, %266 : vector<8x128xf32>
    %268 = arith.mulf %255, %267 : vector<8x128xf32>
    %269 = arith.addf %264, %268 : vector<8x128xf32>
    %270 = math.tanh %269 : vector<8x128xf32>
    %cst_67 = arith.constant 1.000000e+00 : f32
    %271 = vector.broadcast %cst_67 : f32 to vector<8x128xf32>
    %272 = arith.subf %271, %263 : vector<8x128xf32>
    %273 = arith.mulf %272, %270 : vector<8x128xf32>
    %274 = arith.mulf %263, %237 : vector<8x128xf32>
    %275 = arith.addf %273, %274 : vector<8x128xf32>
    %c6_i32 = arith.constant 6 : i32
    %276 = arith.addi %13, %c6_i32 : i32
    %277 = vector.broadcast %276 : i32 to vector<8x1xi32>
    %278 = arith.cmpi eq, %12, %277 : vector<8x1xi32>
    %279 = vector.shape_cast %278 : vector<8x1xi1> to vector<8x1xi1>
    %280 = vector.broadcast %279 : vector<8x1xi1> to vector<8x128xi1>
    %281 = arith.select %280, %275, %243 : vector<8x128xi1>, vector<8x128xf32>
    %c56 = arith.constant 56 : index
    %c0_68 = arith.constant 0 : index
    %282 = vector.load %arg14[%c56, %c0_68] : memref<64x384xf32, #tpu.memory_space<vmem>>, vector<8x384xf32>
    %283 = arith.truncf %275 : vector<8x128xf32> to vector<8x128xbf16>
    %c0_69 = arith.constant 0 : index
    %c0_70 = arith.constant 0 : index
    %284 = vector.load %arg7[%c0_69, %c0_70] : memref<128x384xbf16, #tpu.memory_space<vmem>>, vector<128x384xbf16>
    %cst_71 = arith.constant dense<0.000000e+00> : vector<8x384xf32>
    %285 = tpu.matmul %283, %284, %cst_71 {dimension_numbers = #tpu.dot_dimension_numbers<[1], [0], [0], [1], [0, 0, 1, 1], [], []>} : vector<8x128xbf16>, vector<128x384xbf16>, vector<8x384xf32> -> vector<8x384xf32>
    %286 = vector.extract_strided_slice %282 {offsets = [0, 0], sizes = [8, 128], strides = [1, 1]} : vector<8x384xf32> to vector<8x128xf32>
    %287 = vector.extract_strided_slice %285 {offsets = [0, 0], sizes = [8, 128], strides = [1, 1]} : vector<8x384xf32> to vector<8x128xf32>
    %288 = arith.addf %286, %287 : vector<8x128xf32>
    %289 = arith.negf %288 : vector<8x128xf32>
    %290 = math.exp %289 : vector<8x128xf32>
    %cst_72 = arith.constant 1.000000e+00 : f32
    %291 = vector.broadcast %cst_72 : f32 to vector<8x128xf32>
    %292 = arith.addf %291, %290 : vector<8x128xf32>
    %293 = arith.divf %291, %292 : vector<8x128xf32>
    %294 = vector.extract_strided_slice %282 {offsets = [0, 128], sizes = [8, 128], strides = [1, 1]} : vector<8x384xf32> to vector<8x128xf32>
    %295 = vector.extract_strided_slice %285 {offsets = [0, 128], sizes = [8, 128], strides = [1, 1]} : vector<8x384xf32> to vector<8x128xf32>
    %296 = arith.addf %294, %295 : vector<8x128xf32>
    %297 = arith.negf %296 : vector<8x128xf32>
    %298 = math.exp %297 : vector<8x128xf32>
    %cst_73 = arith.constant 1.000000e+00 : f32
    %299 = vector.broadcast %cst_73 : f32 to vector<8x128xf32>
    %300 = arith.addf %299, %298 : vector<8x128xf32>
    %301 = arith.divf %299, %300 : vector<8x128xf32>
    %302 = vector.extract_strided_slice %282 {offsets = [0, 256], sizes = [8, 128], strides = [1, 1]} : vector<8x384xf32> to vector<8x128xf32>
    %303 = vector.extract_strided_slice %285 {offsets = [0, 256], sizes = [8, 128], strides = [1, 1]} : vector<8x384xf32> to vector<8x128xf32>
    %304 = vector.broadcast %11 : vector<1x128xf32> to vector<8x128xf32>
    %305 = arith.addf %303, %304 : vector<8x128xf32>
    %306 = arith.mulf %293, %305 : vector<8x128xf32>
    %307 = arith.addf %302, %306 : vector<8x128xf32>
    %308 = math.tanh %307 : vector<8x128xf32>
    %cst_74 = arith.constant 1.000000e+00 : f32
    %309 = vector.broadcast %cst_74 : f32 to vector<8x128xf32>
    %310 = arith.subf %309, %301 : vector<8x128xf32>
    %311 = arith.mulf %310, %308 : vector<8x128xf32>
    %312 = arith.mulf %301, %275 : vector<8x128xf32>
    %313 = arith.addf %311, %312 : vector<8x128xf32>
    %c7_i32 = arith.constant 7 : i32
    %314 = arith.addi %13, %c7_i32 : i32
    %315 = vector.broadcast %314 : i32 to vector<8x1xi32>
    %316 = arith.cmpi eq, %12, %315 : vector<8x1xi32>
    %317 = vector.shape_cast %316 : vector<8x1xi1> to vector<8x1xi1>
    %318 = vector.broadcast %317 : vector<8x1xi1> to vector<8x128xi1>
    %319 = arith.select %318, %313, %281 : vector<8x128xi1>, vector<8x128xf32>
    %c0_75 = arith.constant 0 : index
    %c0_76 = arith.constant 0 : index
    %320 = vector.load %arg15[%c0_75, %c0_76] : memref<8x128xf32, #tpu.memory_space<vmem>>, vector<8x128xf32>
    tpu.vector_store %arg15[%c0_75, %c0_76], %313 {strides = array<i32>} : memref<8x128xf32, #tpu.memory_space<vmem>>, vector<8x128xf32>,
    %c0_77 = arith.constant 0 : index
    %c0_78 = arith.constant 0 : index
    %321 = vector.load %arg16[%c0_77, %c0_78] : memref<8x128xf32, #tpu.memory_space<vmem>>, vector<8x128xf32>
    tpu.vector_store %arg16[%c0_77, %c0_78], %319 {strides = array<i32>} : memref<8x128xf32, #tpu.memory_space<vmem>>, vector<8x128xf32>,
    %c0_i32_79 = arith.constant 0 : i32
    %322 = arith.cmpi eq, %arg1, %c0_i32_79 : i32
    %323 = arith.extui %322 : i1 to i32
    %c0_i32_80 = arith.constant 0 : i32
    %324 = arith.cmpi ne, %323, %c0_i32_80 : i32
    scf.if %324 {
      %325 = arith.truncf %319 : vector<8x128xf32> to vector<8x128xbf16>
      %c0_81 = arith.constant 0 : index
      %c0_82 = arith.constant 0 : index
      %326 = vector.load %arg10[%c0_81, %c0_82] : memref<128x128xbf16, #tpu.memory_space<vmem>>, vector<128x128xbf16>
      %cst_83 = arith.constant dense<0.000000e+00> : vector<8x128xf32>
      %327 = tpu.matmul %325, %326, %cst_83 {dimension_numbers = #tpu.dot_dimension_numbers<[1], [0], [0], [1], [0, 0, 1, 1], [], []>} : vector<8x128xbf16>, vector<128x128xbf16>, vector<8x128xf32> -> vector<8x128xf32>
      %c0_84 = arith.constant 0 : index
      %c0_85 = arith.constant 0 : index
      %328 = vector.load %arg4[%c0_84, %c0_85] : memref<8x128xbf16, #tpu.memory_space<vmem>>, vector<8x128xbf16>
      %c0_86 = arith.constant 0 : index
      %c0_87 = arith.constant 0 : index
      %329 = vector.load %arg11[%c0_86, %c0_87] : memref<128x128xbf16, #tpu.memory_space<vmem>>, vector<128x128xbf16>
      %cst_88 = arith.constant dense<0.000000e+00> : vector<8x128xf32>
      %330 = tpu.matmul %328, %329, %cst_88 {dimension_numbers = #tpu.dot_dimension_numbers<[1], [0], [0], [1], [0, 0, 1, 1], [], []>} : vector<8x128xbf16>, vector<128x128xbf16>, vector<8x128xf32> -> vector<8x128xf32>
      %331 = arith.addf %327, %330 : vector<8x128xf32>
      %c0_89 = arith.constant 0 : index
      %c0_90 = arith.constant 0 : index
      %332 = vector.load %arg12[%c0_89, %c0_90] : memref<1x128xf32, #tpu.memory_space<vmem>>, vector<1x128xf32>
      %333 = vector.broadcast %332 : vector<1x128xf32> to vector<8x128xf32>
      %334 = arith.addf %331, %333 : vector<8x128xf32>
      %335 = tpu.iota {dimensions = array<i32: 1>} : vector<8x128xi32>
      %c10_i32 = arith.constant 10 : i32
      %336 = vector.broadcast %c10_i32 : i32 to vector<8x128xi32>
      %337 = arith.cmpi slt, %335, %336 : vector<8x128xi32>
      %cst_91 = arith.constant -1.000000e+30 : f32
      %338 = vector.broadcast %cst_91 : f32 to vector<8x128xf32>
      %339 = arith.select %337, %334, %338 : vector<8x128xi1>, vector<8x128xf32>
      %cst_92 = arith.constant dense<0xFF800000> : vector<8xf32>
      %340 = vector.multi_reduction <maximumf>, %339, %cst_92 [1] : vector<8x128xf32> to vector<8xf32>
      %341 = vector.shape_cast %340 : vector<8xf32> to vector<8x1xf32>
      %342 = vector.broadcast %341 : vector<8x1xf32> to vector<8x128xf32>
      %343 = arith.subf %339, %342 : vector<8x128xf32>
      %344 = math.exp %343 : vector<8x128xf32>
      %cst_93 = arith.constant dense<0.000000e+00> : vector<8xf32>
      %345 = vector.multi_reduction <add>, %344, %cst_93 [1] : vector<8x128xf32> to vector<8xf32>
      %346 = vector.shape_cast %345 : vector<8xf32> to vector<8x1xf32>
      %347 = math.log %346 : vector<8x1xf32>
      %348 = vector.broadcast %347 : vector<8x1xf32> to vector<8x128xf32>
      %349 = arith.subf %343, %348 : vector<8x128xf32>
      %c0_94 = arith.constant 0 : index
      %c0_95 = arith.constant 0 : index
      %350 = vector.load %arg13[%c0_94, %c0_95] : memref<8x128xf32, #tpu.memory_space<vmem>>, vector<8x128xf32>
      tpu.vector_store %arg13[%c0_94, %c0_95], %349 {strides = array<i32>} : memref<8x128xf32, #tpu.memory_space<vmem>>, vector<8x128xf32>,
    } else {
    }
    return
  }
  func.func @transform_0(%arg0: i32, %arg1: i32) -> (i32, i32, i32) {
    %c0_i32 = arith.constant 0 : i32
    %c0_i32_0 = arith.constant 0 : i32
    return %arg1, %arg0, %c0_i32 : i32, i32, i32
  }
  func.func @transform_1(%arg0: i32, %arg1: i32) -> (i32, i32) {
    %c0_i32 = arith.constant 0 : i32
    %c0_i32_0 = arith.constant 0 : i32
    return %arg0, %c0_i32 : i32, i32
  }
  func.func @transform_2(%arg0: i32, %arg1: i32) -> (i32, i32) {
    %c0_i32 = arith.constant 0 : i32
    %c0_i32_0 = arith.constant 0 : i32
    return %arg0, %c0_i32 : i32, i32
  }
  func.func @transform_3(%arg0: i32, %arg1: i32) -> (i32, i32) {
    %c0_i32 = arith.constant 0 : i32
    %c0_i32_0 = arith.constant 0 : i32
    return %arg0, %c0_i32 : i32, i32
  }
  func.func @transform_4(%arg0: i32, %arg1: i32) -> (i32, i32) {
    %c0_i32 = arith.constant 0 : i32
    %c0_i32_0 = arith.constant 0 : i32
    %c0_i32_1 = arith.constant 0 : i32
    return %c0_i32, %c0_i32_0 : i32, i32
  }
  func.func @transform_5(%arg0: i32, %arg1: i32) -> (i32, i32) {
    %c0_i32 = arith.constant 0 : i32
    %c0_i32_0 = arith.constant 0 : i32
    %c0_i32_1 = arith.constant 0 : i32
    return %c0_i32, %c0_i32_0 : i32, i32
  }
  func.func @transform_6(%arg0: i32, %arg1: i32) -> (i32, i32) {
    %c0_i32 = arith.constant 0 : i32
    %c0_i32_0 = arith.constant 0 : i32
    %c0_i32_1 = arith.constant 0 : i32
    return %c0_i32, %c0_i32_0 : i32, i32
  }
  func.func @transform_7(%arg0: i32, %arg1: i32) -> (i32, i32) {
    %c0_i32 = arith.constant 0 : i32
    %c0_i32_0 = arith.constant 0 : i32
    %c0_i32_1 = arith.constant 0 : i32
    return %c0_i32, %c0_i32_0 : i32, i32
  }
  func.func @transform_8(%arg0: i32, %arg1: i32) -> (i32, i32) {
    %c0_i32 = arith.constant 0 : i32
    %c0_i32_0 = arith.constant 0 : i32
    %c0_i32_1 = arith.constant 0 : i32
    return %c0_i32, %c0_i32_0 : i32, i32
  }
  func.func @transform_9(%arg0: i32, %arg1: i32) -> (i32, i32) {
    %c0_i32 = arith.constant 0 : i32
    %c0_i32_0 = arith.constant 0 : i32
    %c0_i32_1 = arith.constant 0 : i32
    return %c0_i32, %c0_i32_0 : i32, i32
  }
  func.func @transform_10(%arg0: i32, %arg1: i32) -> (i32, i32) {
    %c0_i32 = arith.constant 0 : i32
    %c0_i32_0 = arith.constant 0 : i32
    %c0_i32_1 = arith.constant 0 : i32
    return %c0_i32, %c0_i32_0 : i32, i32
  }
  func.func @transform_11(%arg0: i32, %arg1: i32) -> (i32, i32) {
    %c0_i32 = arith.constant 0 : i32
    %c0_i32_0 = arith.constant 0 : i32
    return %arg0, %c0_i32 : i32, i32
  }
}

</mosaic_0001>

<bundles_post_ra>
// kernel: tpu_custom_call.1
= control target key start
LH: loop header
LB: loop body
LE: loop exit
PB: predicated region body
PF: predicated region fallthrough
CT: control target
= control target key end

     0   :  { %16 = vsyncpa [#allocation6], 0  ;;  %s3234_s0 = inlined_call_operand.hbm [shape: bf16[8,8,128], index: 0, kind: input, shape index: {}]   ;;  %s3235_s1 = inlined_call_operand.vmem [shape: s32[8,1], index: 1, kind: input, shape index: {}]   ;;  %s3236_s2 = inlined_call_operand.vmem [shape: bf16[8,128], index: 2, kind: input, shape index: {}]   ;;  %s3237_s3 = inlined_call_operand.vmem [shape: f32[8,128], index: 3, kind: input, shape index: {}]   ;;  %s3238_s4 = inlined_call_operand.hbm [shape: bf16[128,384], index: 4, kind: input, shape index: {}]   ;;  %s3239_s5 = inlined_call_operand.hbm [shape: bf16[128,384], index: 5, kind: input, shape index: {}]   ;;  %s3240_s6 = inlined_call_operand.vmem [shape: f32[1,384], index: 6, kind: input, shape index: {}]   ;;  %s3241_s7 = inlined_call_operand.vmem [shape: f32[1,128], index: 7, kind: input, shape index: {}]   ;;  %s3242_s8 = inlined_call_operand.hbm [shape: bf16[128,128], index: 8, kind: input, shape index: {}]   ;;  %s3243_s9 = inlined_call_operand.hbm [shape: bf16[128,128], index: 9, kind: input, shape index: {}]   ;;  %s3244_s10 = inlined_call_operand.vmem [shape: f32[1,128], index: 10, kind: input, shape index: {}]   ;;  %s3245_s11 = inlined_call_operand.hbm [shape: f32[8,128], index: 11, kind: output, shape index: {}]  }
   0x1   :  { %17 = vsyncpa [#allocation9], 0 }
   0x2   :  { %18 = vsyncpa [#allocation12], 0 }
   0x3   :  { %19 = vsyncpa [#allocation7], 0  ;;  %s2590_s17 = smov [#allocation8]  }
   0x4   :  { %s43_s18 = sshll.u32 %s2590_s17, 4  ;;  %s44_s18 = int_to_ptr.vmem [resolvable:$true] %s43_s18 }
   0x5   :  { %s2470_s19 = scalar_lea.vmem %s44_s18, 3072  ;;  %p2475_p1 = scmp.lt.s32.totalorder %s44_s18, %s44_s18 }
   0x6   :  { %p2471_p0 = scmp.ne.s32.totalorder %s44_s18, %s2470_s19  ;;  %p2476_p2 = scmp.lt.s32.totalorder %s2470_s19, %s2470_s19 }
   0x8   :  { %p2477_p3 = por %p2476_p2, %p2475_p1 }
   0xa   :  { %p2478_p4 = pnand %p2477_p3, %p2471_p0 }
   0xc   :  { %2481 = shalt.err (!%p2478_p4)
}
   0xd   :  { %s2591_s20 = smov 192   ;;  %s2592_s21 = smov 12  }
   0xe   :  { %49 = dma.hbm_to_vmem [thread:$0]  %s3238_s4, 3072, %s44_s18, [#allocation9], %s2591_s20, %s2591_s20, %s2592_s21  }
   0xf   :  { %s2593_s24 = smov [#allocation11]   ;;  %s2594_s26 = smov [#allocation5]  }
  0x10   :  { %s71_s25 = sshll.u32 %s2593_s24, 4  ;;  %s25_s27 = sshll.u32 %s2594_s26, 4  ;;  %s72_s25 = int_to_ptr.vmem [resolvable:$true] %s71_s25  ;;  %s26_s27 = int_to_ptr.vmem [resolvable:$true] %s25_s27 }
  0x11   :  { %s2490_s28 = scalar_lea.vmem %s72_s25, 1024  ;;  %p2495_p6 = scmp.lt.s32.totalorder %s72_s25, %s72_s25 }
  0x12   :  { %p2491_p5 = scmp.ne.s32.totalorder %s72_s25, %s2490_s28  ;;  %p2496_p7 = scmp.lt.s32.totalorder %s2490_s28, %s2490_s28 }
  0x14   :  { %p2497_p8 = por %p2496_p7, %p2495_p6 }
  0x16   :  { %p2498_p9 = pnand %p2497_p8, %p2491_p5 }
  0x18   :  { %2501 = shalt.err (!%p2498_p9)
}
  0x19   :  { %s2595_s29 = smov 64   ;;  %s2596_s30 = smov 4  }
  0x1a   :  { %77 = dma.hbm_to_vmem [thread:$0]  %s3242_s8, 1024, %s72_s25, [#allocation12], %s2595_s29, %s2595_s29, %s2596_s30  }
  0x1b   :  { %s2510_s4 = scalar_lea.vmem %s26_s27, 512  ;;  %p2515_p11 = scmp.lt.s32.totalorder %s26_s27, %s26_s27 }
  0x1c   :  { %p2511_p10 = scmp.ne.s32.totalorder %s26_s27, %s2510_s4  ;;  %p2516_p12 = scmp.lt.s32.totalorder %s2510_s4, %s2510_s4 }
  0x1e   :  { %p2517_p13 = por %p2516_p12, %p2515_p11 }
  0x20   :  { %p2518_p0 = pnand %p2517_p13, %p2511_p10 }
  0x22   :  { %2521 = shalt.err (!%p2518_p0)
}
  0x23   :  { %31 = dma.hbm_to_vmem [thread:$0]  %s3234_s0, 512, %s26_s27, [#allocation6], %s2595_s29, %s2595_s29, %s2596_s30  }
  0x24   :  { %s2597_s16 = smov [#allocation10]   ;;  %s2598_s18 = smov [#allocation13]  }
  0x25   :  { %s55_s17 = sshll.u32 %s2597_s16, 4  ;;  %s83_s8 = sshll.u32 %s2598_s18, 4  ;;  %s56_s17 = int_to_ptr.vmem [resolvable:$true] %s55_s17  ;;  %s84_s8 = int_to_ptr.vmem [resolvable:$true] %s83_s8 }
  0x26   :  { %s2530_s19 = scalar_lea.vmem %s56_s17, 3072  ;;  %p2535_p2 = scmp.lt.s32.totalorder %s56_s17, %s56_s17 }
  0x27   :  { %p2531_p1 = scmp.ne.s32.totalorder %s56_s17, %s2530_s19  ;;  %p2536_p3 = scmp.lt.s32.totalorder %s2530_s19, %s2530_s19 }
  0x29   :  { %p2537_p4 = por %p2536_p3, %p2535_p2 }
  0x2b   :  { %p2538_p5 = pnand %p2537_p4, %p2531_p1 }
  0x2d   :  { %2541 = shalt.err (!%p2538_p5)
}
  0x2e   :  { %61 = dma.hbm_to_vmem [thread:$0]  %s3239_s5, 3072, %s56_s17, [#allocation9], %s2591_s20, %s2591_s20, %s2592_s21  }
  0x2f   :  { %s2550_s0 = scalar_lea.vmem %s84_s8, 1024  ;;  %p2555_p7 = scmp.lt.s32.totalorder %s84_s8, %s84_s8 }
  0x30   :  { %p2551_p6 = scmp.ne.s32.totalorder %s84_s8, %s2550_s0  ;;  %p2556_p8 = scmp.lt.s32.totalorder %s2550_s0, %s2550_s0 }
  0x32   :  { %p2557_p9 = por %p2556_p8, %p2555_p7 }
  0x34   :  { %p2558_p10 = pnand %p2557_p9, %p2551_p6 }
  0x36   :  { %2561 = shalt.err (!%p2558_p10)
}
  0x37   :  { %89 = dma.hbm_to_vmem [thread:$0]  %s3243_s9, 1024, %s84_s8, [#allocation12], %s2595_s29, %s2595_s29, %s2596_s30  }
  0x38   :  { %2582 = dma.done.wait [#allocation6], 512  }
  0x39   :  { %2583 = vsyncadd [#allocation6], 4294966784 }
  0x3a   :  { %2584 = dma.done.wait [#allocation9], 6144  }
  0x3b   :  { %2585 = vsyncadd [#allocation9], 4294961152 }
  0x3c   :  { %2586 = dma.done.wait [#allocation12], 2048  }
  0x3d   :  { %2587 = vsyncadd [#allocation12], 4294965248  ;;  %v3247_v0 = vmov 0   ;;  %v2267_v1 = vld [vmem:[#allocation8 + $0xac] ss:$12 sps:$4 sm:$0xff]   ;;  %v2293_v12 = vld [vmem:[#allocation5] sm:$0xff]   ;;  %v3246_v59 = vlaneseq }
  0x3e   :  { %357 = vmatprep.mubr.bf16.mxu0 %v3247_v0  ;;  %2265 = vset.pattern.permute.xlu0 %v3247_v0  ;;  %v2269_v2 = vld [vmem:[#allocation8 + $0xa8] ss:$12 sps:$4 sm:$0xff]   ;;  %v2272_v4 = vld [vmem:[#allocation8 + $0x90] ss:$12 sps:$4 sm:$0xff]   ;;  %v2275_v6 = vld [vmem:[#allocation8 + $0x78] ss:$12 sps:$4 sm:$0xff]  }
  0x3f   :  { %2266 = vset.pattern.permute.xlu1 %v3247_v0  ;;  %325 = vmatprep.subr.bf16.mxu0 %v2267_v1  ;;  %v2270_v3 = vld [vmem:[#allocation8 + $0x94] ss:$12 sps:$4 sm:$0xff]   ;;  %v2273_v5 = vld [vmem:[#allocation8 + $0x7c] ss:$12 sps:$4 sm:$0xff]   ;;  %v2276_v7 = vld [vmem:[#allocation8 + $0x64] ss:$12 sps:$4 sm:$0xff]  }
  0x40   :  { %326 = vmatpush1.bf16.msra.mxu0 %v2269_v2  ;;  %v2288_v8 = vld [vmem:[#allocation8 + $0xb0] ss:$12 sps:$4 sm:$0xff]   ;;  %v2278_v9 = vld [vmem:[#allocation8 + $0x60] ss:$12 sps:$4 sm:$0xff]   ;;  %v2292_v11 = vld [vmem:[#allocation8 + $0x98] ss:$12 sps:$4 sm:$0xff]   ;;  %2044 = vmatprep.mubr.bf16.mxu1 %v2293_v12 }
  0x41   :  { %327 = vmatprep.subr.bf16.mxu0 %v2270_v3  ;;  %v2279_v10 = vld [vmem:[#allocation8 + $0x4c] ss:$12 sps:$4 sm:$0xff]   ;;  %2028 = vmatprep.subr.bf16.mxu1 %v2288_v8  ;;  %v2281_v13 = vld [vmem:[#allocation8 + $0x48] ss:$12 sps:$4 sm:$0xff]   ;;  %v2284_v17 = vld [vmem:[#allocation8 + $0x30] ss:$12 sps:$4 sm:$0xff]  }
  0x42   :  { %2029 = vmatpush3.bf16.msra.mxu1 %v2288_v8  ;;  %v2297_v14 = vld [vmem:[#allocation8 + $0x80] ss:$12 sps:$4 sm:$0xff]   ;;  %v2301_v16 = vld [vmem:[#allocation8 + $0x68] ss:$12 sps:$4 sm:$0xff]   ;;  %v2306_v19 = vld [vmem:[#allocation8 + $0x50] ss:$12 sps:$4 sm:$0xff]  }
  0x43   :  { %2030 = vmatprep.subr.bf16.mxu1 %v2292_v11  ;;  %v2282_v15 = vld [vmem:[#allocation8 + $0x34] ss:$12 sps:$4 sm:$0xff]   ;;  %v2285_v18 = vld [vmem:[#allocation8 + $0x1c] ss:$12 sps:$4 sm:$0xff]   ;;  %v2287_v20 = vld [vmem:[#allocation8 + $0x18] ss:$12 sps:$4 sm:$0xff]  }
  0x44   :  { %328 = vmatpush1.bf16.msra.mxu0 %v2272_v4  ;;  %v2289_v21 = vld [vmem:[#allocation8 + $0x4] ss:$12 sps:$4 sm:$0xff]   ;;  %v2291_v23 = vld [vmem:[#allocation8] ss:$12 sps:$4 sm:$0xff]   ;;  %v2698_v26 = vld [vmem:[#allocation10 + $0xa8] ss:$12 sps:$4 sm:$0xff]  }
  0x45   :  { %329 = vmatprep.subr.bf16.mxu0 %v2273_v5  ;;  %v2310_v22 = vld [vmem:[#allocation8 + $0x38] ss:$12 sps:$4 sm:$0xff]   ;;  %v2315_v25 = vld [vmem:[#allocation8 + $0x20] ss:$12 sps:$4 sm:$0xff]   ;;  %v2319_v28 = vld [vmem:[#allocation8 + $0x8] ss:$12 sps:$4 sm:$0xff]  }
  0x46   :  { %2031 = vmatpush3.bf16.msra.mxu1 %v2292_v11  ;;  %v2696_v24 = vld [vmem:[#allocation10 + $0xac] ss:$12 sps:$4 sm:$0xff]   ;;  %v2701_v27 = vld [vmem:[#allocation10 + $0x94] ss:$12 sps:$4 sm:$0xff]   ;;  %v2704_v29 = vld [vmem:[#allocation10 + $0x90] ss:$12 sps:$4 sm:$0xff]  }
  0x47   :  { %2032 = vmatprep.subr.bf16.mxu1 %v2297_v14  ;;  %v2708_v30 = vld [vmem:[#allocation10 + $0x7c] ss:$12 sps:$4 sm:$0xff]   ;;  %v2711_v32 = vld [vmem:[#allocation10 + $0x78] ss:$12 sps:$4 sm:$0xff]   ;;  %v2716_v34 = vld [vmem:[#allocation10 + $0x60] ss:$12 sps:$4 sm:$0xff]  }
  0x48   :  { %330 = vmatpush1.bf16.msra.mxu0 %v2275_v6  ;;  %v2302_v31 = vld [vmem:[#allocation5 + $0x8] sm:$0xff]   ;;  %v2714_v33 = vld [vmem:[#allocation10 + $0x64] ss:$12 sps:$4 sm:$0xff]   ;;  %v3249_v38 = vmov 0.0   ;;  %v2738_v43 = vld [vmem:[#allocation10 + $0x34] ss:$12 sps:$4 sm:$0xff]  }
  0x49   :  { %331 = vmatprep.subr.bf16.mxu0 %v2276_v7  ;;  %v2718_v35 = vld [vmem:[#allocation10 + $0xb0] ss:$12 sps:$4 sm:$0xff]   ;;  %v2723_v36 = vld [vmem:[%s3235_s1] sm:$0xff]  ;;  %v2725_v37 = vld [vmem:[#allocation10 + $0x4c] ss:$12 sps:$4 sm:$0xff]   ;;  %vm2601_vm1 = vmmov 0  }
  0x4a   :  { %2033 = vmatpush3.bf16.msra.mxu1 %v2297_v14  ;;  %vm766_vm0 = vcmp.eq.s32.totalorder %v2723_v36, 0  ;;  %v2311_v39 = vld [vmem:[#allocation5 + $0x10] sm:$0xff]   ;;  %v2731_v40 = vld [vmem:[#allocation10 + $0x98] ss:$12 sps:$4 sm:$0xff]   ;;  %v2742_v44 = vld [vmem:[#allocation10 + $0x80] ss:$12 sps:$4 sm:$0xff]  }
  0x4b   :  { %2034 = vmatprep.subr.bf16.mxu1 %v2301_v16  ;;  %v767_v41 = vsel %vm766_vm0, 1, %v3247_v0  ;;  %v2735_v42 = vld [vmem:[#allocation10 + $0x48] ss:$12 sps:$4 sm:$0xff]   ;;  %v2320_v45 = vld [vmem:[#allocation5 + $0x18] sm:$0xff]   ;;  %v2764_v50 = vld [vmem:[#allocation10 + $0x4] ss:$12 sps:$4 sm:$0xff]  }
  0x4c   :  { %332 = vmatpush1.bf16.msra.mxu0 %v2278_v9  ;;  %769 = vperm.xlu0 %2265, %v767_v41   ;;  %v2745_v46 = vld [vmem:[#allocation10 + $0x30] ss:$12 sps:$4 sm:$0xff]   ;;  %v2755_v48 = vld [vmem:[#allocation10 + $0x68] ss:$12 sps:$4 sm:$0xff]   ;;  %v2761_v49 = vld [vmem:[#allocation10 + $0x18] ss:$12 sps:$4 sm:$0xff]  }
  0x4d   :  { %333 = vmatprep.subr.bf16.mxu0 %v2279_v10  ;;  %v2748_v47 = vld [vmem:[#allocation10 + $0x1c] ss:$12 sps:$4 sm:$0xff]   ;;  %v2771_v52 = vld [vmem:[#allocation10] ss:$12 sps:$4 sm:$0xff]   ;;  %v2781_v54 = vld [vmem:[#allocation10 + $0x38] ss:$12 sps:$4 sm:$0xff]  }
  0x4e   :  { %2035 = vmatpush3.bf16.msra.mxu1 %v2301_v16  ;;  %v2767_v51 = vld [vmem:[#allocation10 + $0x50] ss:$12 sps:$4 sm:$0xff]   ;;  %v2777_v53 = vld [vmem:[%s3237_s3] sm:$0xff]  ;;  %v2796_v57 = vld [vmem:[#allocation10 + $0x8] ss:$12 sps:$4 sm:$0xff]   ;;  %vm882_vm2 = vcmp.eq.s32.totalorder %v2723_v36, 1 }
  0x4f   :  { %2036 = vmatprep.subr.bf16.mxu1 %v2306_v19  ;;  %v495_v55 = vpack.c.bf16 %v2777_v53, %v2777_v53  ;;  %v2789_v56 = vld [vmem:[#allocation10 + $0x20] ss:$12 sps:$4 sm:$0xff]   ;;  %v883_v58 = vsel %vm882_vm2, 1, %v3247_v0  ;;  %v159_v60 = vshrl.u32 %v3246_v59, 7  ;;  %vm998_vm3 = vcmp.eq.s32.totalorder %v2723_v36, 2  ;;  %s2602_s15 = smov [#allocation14]  }
  0x50   :  { %334 = vmatpush1.bf16.msra.mxu0 %v2281_v13  ;;  %885 = vperm.xlu0 %2265, %v883_v58   ;;  %v156_v62 = vld [vmem:[%s3240_s6] sm:$0x7]  ;;  %vm1114_vm4 = vcmp.eq.s32.totalorder %v2723_v36, 3  ;;  %vm1230_vm5 = vcmp.eq.s32.totalorder %v2723_v36, 4  ;;  %vm1346_vm6 = vcmp.eq.s32.totalorder %v2723_v36, 5  ;;  %s1829_s16 = sshll.u32 %s2602_s15, 4  ;;  %s1830_s16 = int_to_ptr.vmem [resolvable:$true] %s1829_s16 }
  0x51   :  { %335 = vmatprep.subr.bf16.mxu0 %v2282_v15  ;;  %v160_v61 = vsub.s32 0, %v159_v60  ;;  %v164_v1 = vsub.s32 1, %v159_v60  ;;  %v168_v4 = vsub.s32 2, %v159_v60  ;;  %p2567_p12 = scmp.lt.s32.totalorder %s1830_s16, %s1830_s16 }
  0x52   :  { %2037 = vmatpush3.bf16.msra.mxu1 %v2306_v19 }
  0x53   :  { %2038 = vmatprep.subr.bf16.mxu1 %v2310_v22  ;;  %v161_v3 = vrot.slane %v156_v62, %v160_v61  ;;  %v165_v6 = vrot.slane %v156_v62, %v164_v1  ;;  %v2843_v10 = vrot.slane %v156_v62, %v168_v4 }
  0x54   :  { %336 = vmatpush1.bf16.msra.mxu0 %v2284_v17 }
  0x55   :  { %337 = vmatprep.subr.bf16.mxu0 %v2285_v18 }
  0x56   :  { %2039 = vmatpush3.bf16.msra.mxu1 %v2310_v22 }
  0x57   :  { %2040 = vmatprep.subr.bf16.mxu1 %v2315_v25 }
  0x58   :  { %338 = vmatpush1.bf16.msra.mxu0 %v2287_v20 }
  0x59   :  { %339 = vmatprep.subr.bf16.mxu0 %v2289_v21 }
  0x5a   :  { %2041 = vmatpush3.bf16.msra.mxu1 %v2315_v25 }
  0x5b   :  { %2042 = vmatprep.subr.bf16.mxu1 %v2319_v28 }
  0x5c   :  { %340 = vmatpush1.bf16.msra.mxu0 %v2291_v23 }
  0x5d   :  { %656 = vmatprep.subr.bf16.mxu0 %v2696_v24 }
  0x5e   :  { %2043 = vmatpush3.bf16.msra.mxu1 %v2319_v28 }
  0x5f   :  { %358 = vmatmul.mubr.bf16.vlgmr.msra.gmra.mxu0 %v2293_v12  ;;  %2052 = vmatprep.subr.bf16.mxu1 %v3249_v38 }
  0x60   :  { %657 = vmatpush1.bf16.msra.mxu0 %v2698_v26  ;;  %367 = vmatprep.mubr.bf16.mxu0 %v3247_v0 }
  0x61   :  { %658 = vmatprep.subr.bf16.mxu0 %v2701_v27  ;;  %2045 = vmatmul.mubr.bf16.vlgmr.msra.gmra.mxu1 %v2302_v31 }
  0x62   :  { %2053 = vmatpush3.bf16.msra.mxu1 %v2718_v35  ;;  %2048 = vmatprep.mubr.bf16.mxu1 %v2311_v39 }
  0x63   :  { %2054 = vmatprep.subr.bf16.mxu1 %v3249_v38 }
  0x64   :  { %659 = vmatpush1.bf16.msra.mxu0 %v2704_v29 }
  0x65   :  { %660 = vmatprep.subr.bf16.mxu0 %v2708_v30 }
  0x66   :  { %2055 = vmatpush3.bf16.msra.mxu1 %v2731_v40 }
  0x67   :  { %368 = vmatmul.mubr.bf16.gmra.mxu0 %v2302_v31  ;;  %2056 = vmatprep.subr.bf16.mxu1 %v3249_v38 }
  0x68   :  { %661 = vmatpush1.bf16.msra.mxu0 %v2711_v32  ;;  %377 = vmatprep.mubr.bf16.mxu0 %v3247_v0 }
  0x69   :  { %662 = vmatprep.subr.bf16.mxu0 %v2714_v33  ;;  %2049 = vmatmul.mubr.bf16.gmra.mxu1 %v2320_v45 }
  0x6a   :  { %2057 = vmatpush3.bf16.msra.mxu1 %v2742_v44  ;;  %2068 = vmatprep.mubr.msk.bf16.mxu1 %vm2601_vm1, %v3249_v38 }
  0x6b   :  { %2058 = vmatprep.subr.bf16.mxu1 %v3249_v38 }
  0x6c   :  { %663 = vmatpush1.bf16.msra.mxu0 %v2716_v34 }
  0x6d   :  { %664 = vmatprep.subr.bf16.mxu0 %v2725_v37 }
  0x6e   :  { %2059 = vmatpush3.bf16.msra.mxu1 %v2755_v48 }
  0x6f   :  { %378 = vmatmul.mubr.bf16.gmra.mxu0 %v2311_v39  ;;  %2060 = vmatprep.subr.bf16.mxu1 %v3249_v38 }
  0x70   :  { %665 = vmatpush1.bf16.msra.mxu0 %v2735_v42  ;;  %387 = vmatprep.mubr.bf16.mxu0 %v3247_v0 }
  0x71   :  { %666 = vmatprep.subr.bf16.mxu0 %v2738_v43 }
  0x72   :  { %2061 = vmatpush3.bf16.msra.mxu1 %v2767_v51 }
  0x73   :  { %2062 = vmatprep.subr.bf16.mxu1 %v3249_v38 }
  0x74   :  { %667 = vmatpush1.bf16.msra.mxu0 %v2745_v46 }
  0x75   :  { %668 = vmatprep.subr.bf16.mxu0 %v2748_v47 }
  0x76   :  { %2063 = vmatpush3.bf16.msra.mxu1 %v2781_v54 }
  0x77   :  { %388 = vmatmul.mubr.bf16.gmra.mxu0 %v2320_v45  ;;  %2064 = vmatprep.subr.bf16.mxu1 %v3249_v38 }
  0x78   :  { %669 = vmatpush1.bf16.msra.mxu0 %v2761_v49  ;;  %688 = vmatprep.mubr.bf16.mxu0 %v3247_v0 }
  0x79   :  { %670 = vmatprep.subr.bf16.mxu0 %v2764_v50 }
  0x7a   :  { %2065 = vmatpush3.bf16.msra.mxu1 %v2789_v56 }
  0x7b   :  { %2066 = vmatprep.subr.bf16.mxu1 %v3249_v38 }
  0x7c   :  { %671 = vmatpush1.bf16.msra.mxu0 %v2771_v52 }
  0x7d   :  { %777 = vmatprep.subr.bf16.mxu0 %v2696_v24 }
  0x7e   :  { %2067 = vmatpush3.bf16.msra.mxu1 %v2796_v57 }
  0x7f   :  { %689 = vmatmul.mubr.bf16.vlgmr.msra.gmra.mxu0 %v495_v55  ;;  %2072 = vmatprep.subr.bf16.mxu1 %v3249_v38 }
  0x80   :  { %778 = vmatpush1.bf16.msra.mxu0 %v2698_v26  ;;  %809 = vmatprep.mubr.bf16.mxu0 %v3247_v0 }
  0x81   :  { %779 = vmatprep.subr.bf16.mxu0 %v2701_v27  ;;  %2069 = vmatmul.mubr.bf16.vlgmr.msra.gmra.mxu1 %v495_v55 }
  0x82   :  { %2073 = vmatpush3.bf16.msra.mxu1 %v2718_v35  ;;  %2088 = vmatprep.mubr.msk.bf16.mxu1 %vm2601_vm1, %v3249_v38 }
  0x83   :  { %2074 = vmatprep.subr.bf16.mxu1 %v3249_v38 }
  0x84   :  { %780 = vmatpush1.bf16.msra.mxu0 %v2704_v29 }
  0x85   :  { %781 = vmatprep.subr.bf16.mxu0 %v2708_v30 }
  0x86   :  { %2075 = vmatpush3.bf16.msra.mxu1 %v2731_v40 }
  0x87   :  { %2076 = vmatprep.subr.bf16.mxu1 %v3249_v38 }
  0x88   :  { %782 = vmatpush1.bf16.msra.mxu0 %v2711_v32 }
  0x89   :  { %783 = vmatprep.subr.bf16.mxu0 %v2714_v33 }
  0x8a   :  { %2077 = vmatpush3.bf16.msra.mxu1 %v2742_v44 }
  0x8b   :  { %2078 = vmatprep.subr.bf16.mxu1 %v3249_v38 }
  0x8c   :  { %784 = vmatpush1.bf16.msra.mxu0 %v2716_v34 }
  0x8d   :  { %785 = vmatprep.subr.bf16.mxu0 %v2725_v37 }
  0x8e   :  { %2079 = vmatpush3.bf16.msra.mxu1 %v2755_v48 }
  0x8f   :  { %2080 = vmatprep.subr.bf16.mxu1 %v3249_v38 }
  0x90   :  { %786 = vmatpush1.bf16.msra.mxu0 %v2735_v42 }
  0x91   :  { %787 = vmatprep.subr.bf16.mxu0 %v2738_v43 }
  0x92   :  { %2081 = vmatpush3.bf16.msra.mxu1 %v2767_v51 }
  0x93   :  { %2082 = vmatprep.subr.bf16.mxu1 %v3249_v38 }
  0x94   :  { %788 = vmatpush1.bf16.msra.mxu0 %v2745_v46 }
  0x95   :  { %789 = vmatprep.subr.bf16.mxu0 %v2748_v47 }
  0x96   :  { %2083 = vmatpush3.bf16.msra.mxu1 %v2781_v54 }
  0x97   :  { %2084 = vmatprep.subr.bf16.mxu1 %v3249_v38 }
  0x98   :  { %790 = vmatpush1.bf16.msra.mxu0 %v2761_v49 }
  0x99   :  { %791 = vmatprep.subr.bf16.mxu0 %v2764_v50 }
  0x9a   :  { %2085 = vmatpush3.bf16.msra.mxu1 %v2789_v56 }
  0x9b   :  { %2086 = vmatprep.subr.bf16.mxu1 %v3249_v38 }
  0x9c   :  { %792 = vmatpush1.bf16.msra.mxu0 %v2771_v52 }
  0x9d   :  { %893 = vmatprep.subr.bf16.mxu0 %v2696_v24 }
  0x9e   :  { %2087 = vmatpush3.bf16.msra.mxu1 %v2796_v57 }
  0x9f   :  { %2092 = vmatprep.subr.bf16.mxu1 %v3249_v38 }
 0x11f   :  { %v359_v63 = vpop.f32.mrf.mxu0 }
 0x121   :  { %v361_v2 = vpop.f32.mrf.mxu0  ;;  %v2046_v14 = vpop.f32.mrf.mxu1 }
 0x122   :  { %v2850_v16 = vadd.f32 %v2046_v14, %v2843_v10 }
 0x123   :  { %v363_v5 = vpop.f32.mrf.mxu0  ;;  %v432_v18 = vpop.f32.mrf.mxu1 }
 0x124   :  { %v2839_v7 = vadd.f32 %v363_v5, %v161_v3 }
 0x125   :  { %v365_v8 = vpop.f32.mrf.mxu0  ;;  %v2047_v21 = vpop.f32.mrf.mxu1 }
 0x126   :  { %v2841_v9 = vadd.f32 %v365_v8, %v165_v6  ;;  %v2857_v23 = vadd.f32 %v2047_v21, %v2843_v10 }
 0x127   :  { %v369_v11 = vpop.f32.mrf.mxu0  ;;  %v435_v28 = vpop.f32.mrf.mxu1 }
 0x128   :  { %v2845_v12 = vadd.f32 %v369_v11, %v161_v3  ;;  %v2862_v39 = vadd.f32 %v435_v28, %v2843_v10 }
 0x129   :  { %v371_v13 = vpop.f32.mrf.mxu0  ;;  %v2050_v45 = vpop.f32.mrf.mxu1 }
 0x12a   :  { %v2847_v15 = vadd.f32 %v371_v13, %v165_v6  ;;  %v2867_v58 = vadd.f32 %v2050_v45, %v2843_v10 }
 0x12b   :  { %v373_v17 = vpop.f32.mrf.mxu0  ;;  %v448_v61 = vpop.f32.mrf.mxu1 }
 0x12c   :  { %v2852_v19 = vadd.f32 %v373_v17, %v161_v3  ;;  %3251 = vst [vmem:[#allocation19_spill] sm:$0xff] %v2867_v58  ;;  %v2872_v1 = vadd.f32 %v448_v61, %v2843_v10 }
 0x12d   :  { %v375_v20 = vpop.f32.mrf.mxu0  ;;  %v2051_v5 = vpop.f32.mrf.mxu1 }
 0x12e   :  { %v2854_v22 = vadd.f32 %v375_v20, %v165_v6  ;;  %v2877_v11 = vadd.f32 %v2051_v5, %v2843_v10 }
 0x12f   :  { %v379_v25 = vpop.f32.mrf.mxu0  ;;  %v451_v14 = vpop.f32.mrf.mxu1 }
 0x130   :  { %v2859_v31 = vadd.f32 %v379_v25, %v161_v3  ;;  %3252 = vst [vmem:[#allocation20_spill] sm:$0xff] %v2877_v11  ;;  %v2882_v20 = vadd.f32 %v451_v14, %v2843_v10 }
 0x131   :  { %v381_v41 = vpop.f32.mrf.mxu0 }
 0x132   :  { %v2864_v55 = vadd.f32 %v381_v41, %v165_v6  ;;  %3254 = vst [vmem:[#allocation22_spill] sm:$0xff] %v2882_v20 }
 0x133   :  { %v383_v60 = vpop.f32.mrf.mxu0 }
 0x134   :  { %v2869_v62 = vadd.f32 %v383_v60, %v161_v3  ;;  %v360_v60 = vadd.f32 %v359_v63, %v161_v3 }
 0x135   :  { %v385_v4 = vpop.f32.mrf.mxu0 }
 0x136   :  { %v2874_v8 = vadd.f32 %v385_v4, %v165_v6 }
 0x137   :  { %v389_v13 = vpop.f32.mrf.mxu0 }
 0x138   :  { %v2879_v17 = vadd.f32 %v389_v13, %v161_v3  ;;  %v362_v13 = vadd.f32 %v361_v2, %v165_v6 }
 0x139   :  { %v391_v21 = vpop.f32.mrf.mxu0 }
 0x13a   :  { %3253 = vst [vmem:[#allocation21_spill] sm:$0xff] %v2879_v17  ;;  %v2884_v25 = vadd.f32 %v391_v21, %v165_v6 }
 0x13b   :  { %v393_v28 = vpop.f32.mrf.mxu0 }
 0x13c   :  { %3255 = vst [vmem:[#allocation23_spill] sm:$0xff] %v2884_v25  ;;  %v2886_v41 = vadd.f32 %v393_v28, %v161_v3  ;;  %v2893_v3 = vld [vmem:[%s3241_s7] ss:$0 sm:$0xff] }
 0x13d   :  { %v395_v45 = vpop.f32.mrf.mxu0 }
 0x13e   :  { %3256 = vst [vmem:[#allocation24_spill] sm:$0xff] %v2886_v41  ;;  %v2888_v61 = vadd.f32 %v395_v45, %v165_v6 }
 0x13f   :  { %v690_v4 = vpop.f32.mrf.mxu0 }
 0x140   :  { %v737_v5 = vadd.f32 %v690_v4, %v360_v60 }
 0x141   :  { %v692_v59 = vpop.f32.mrf.mxu0  ;;  %v731_v58 = vpop.f32.mrf.mxu1 }
 0x142   :  { %v1892_v0 = vmul.f32 -1.442695, %v737_v5  ;;  %v744_v14 = vadd.f32 %v692_v59, %v362_v13  ;;  %v433_v59 = vadd.f32 %v432_v18, %v2843_v10  ;;  %v3257_v10 = vmov 0.0  }
 0x143   :  { %v694_v38 = vpop.f32.mrf.mxu0  ;;  %v2070_v21 = vpop.f32.mrf.mxu1  ;;  %v3258_v18 = vmov 0  }
 0x144   :  { %2351 = vpow2.f32 %v1892_v0  ;;  %v1893_v17 = vmul.f32 -1.442695, %v744_v14  ;;  %v757_v0 = vadd.f32 %v2893_v3, %v731_v58 }
 0x145   :  { %v695_v11 = vpop.f32.mrf.mxu0  ;;  %v734_v25 = vpop.f32.mrf.mxu1 }
 0x146   :  { %2353 = vpow2.f32 %v1893_v17 }
 0x147   :  { %v2071_v28 = vpop.f32.mrf.mxu1 }
 0x151   :  { %v2352_v41 = vpop.eup %2351 }
 0x152   :  { %v741_v20 = vadd.f32 1.0, %v2352_v41 }
 0x153   :  { %v2354_v63 = vpop.eup %2353 }
 0x154   :  { %2355 = vrcp.f32 %v741_v20  ;;  %v748_v38 = vadd.f32 1.0, %v2354_v63 }
 0x156   :  { %2357 = vrcp.f32 %v748_v38 }
 0x161   :  { %v2356_v2 = vpop.eup %2355 }
 0x162   :  { %v758_v6 = vmul.f32 %v2356_v2, %v757_v0 }
 0x163   :  { %v2358_v17 = vpop.eup %2357 }
 0x164   :  { %v759_v11 = vadd.f32 %v758_v6, %v433_v59  ;;  %v761_v25 = vsub.f32 1.0, %v2358_v17  ;;  %v763_v45 = vmul.f32 %v2358_v17, %v2777_v53  ;;  %v999_v53 = vsel %vm998_vm3, 1, %v3258_v18 }
 0x165   :  { %1001 = vperm.xlu1 %2266, %v999_v53  }
 0x166   :  { %2359 = vtanh.f32 %v759_v11 }
 0x173   :  { %v2360_v41 = vpop.eup %2359 }
 0x174   :  { %v762_v20 = vmul.f32 %v2360_v41, %v761_v25 }
 0x176   :  { %v2898_v60 = vadd.f32 %v763_v45, %v762_v20 }
 0x178   :  { %v776_v4 = vpack.c.bf16 %v2898_v60, %v2898_v60 }
 0x17a   :  { %810 = vmatmul.mubr.bf16.vlgmr.msra.gmra.mxu0 %v776_v4  ;;  %2089 = vmatmul.mubr.bf16.vlgmr.msra.gmra.mxu1 %v776_v4 }
 0x17b   :  { %894 = vmatpush1.bf16.msra.mxu0 %v2698_v26  ;;  %2093 = vmatpush3.bf16.msra.mxu1 %v2718_v35 }
 0x17c   :  { %895 = vmatprep.subr.bf16.mxu0 %v2701_v27  ;;  %2094 = vmatprep.subr.bf16.mxu1 %v3257_v10 }
 0x17d   :  { %925 = vmatprep.mubr.bf16.mxu0 %v3258_v18  ;;  %2108 = vmatprep.mubr.msk.bf16.mxu1 %vm2601_vm1, %v3257_v10 }
 0x17f   :  { %896 = vmatpush1.bf16.msra.mxu0 %v2704_v29  ;;  %2095 = vmatpush3.bf16.msra.mxu1 %v2731_v40 }
 0x180   :  { %897 = vmatprep.subr.bf16.mxu0 %v2708_v30  ;;  %2096 = vmatprep.subr.bf16.mxu1 %v3257_v10 }
 0x183   :  { %898 = vmatpush1.bf16.msra.mxu0 %v2711_v32  ;;  %2097 = vmatpush3.bf16.msra.mxu1 %v2742_v44 }
 0x184   :  { %899 = vmatprep.subr.bf16.mxu0 %v2714_v33  ;;  %2098 = vmatprep.subr.bf16.mxu1 %v3257_v10 }
 0x187   :  { %900 = vmatpush1.bf16.msra.mxu0 %v2716_v34  ;;  %2099 = vmatpush3.bf16.msra.mxu1 %v2755_v48 }
 0x188   :  { %901 = vmatprep.subr.bf16.mxu0 %v2725_v37  ;;  %2100 = vmatprep.subr.bf16.mxu1 %v3257_v10 }
 0x18b   :  { %902 = vmatpush1.bf16.msra.mxu0 %v2735_v42  ;;  %2101 = vmatpush3.bf16.msra.mxu1 %v2767_v51 }
 0x18c   :  { %903 = vmatprep.subr.bf16.mxu0 %v2738_v43  ;;  %2102 = vmatprep.subr.bf16.mxu1 %v3257_v10 }
 0x18f   :  { %904 = vmatpush1.bf16.msra.mxu0 %v2745_v46  ;;  %2103 = vmatpush3.bf16.msra.mxu1 %v2781_v54 }
 0x190   :  { %905 = vmatprep.subr.bf16.mxu0 %v2748_v47  ;;  %2104 = vmatprep.subr.bf16.mxu1 %v3257_v10 }
 0x193   :  { %906 = vmatpush1.bf16.msra.mxu0 %v2761_v49  ;;  %2105 = vmatpush3.bf16.msra.mxu1 %v2789_v56 }
 0x194   :  { %907 = vmatprep.subr.bf16.mxu0 %v2764_v50  ;;  %2106 = vmatprep.subr.bf16.mxu1 %v3257_v10 }
 0x197   :  { %908 = vmatpush1.bf16.msra.mxu0 %v2771_v52  ;;  %2107 = vmatpush3.bf16.msra.mxu1 %v2796_v57 }
 0x198   :  { %1009 = vmatprep.subr.bf16.mxu0 %v2696_v24  ;;  %2112 = vmatprep.subr.bf16.mxu1 %v3257_v10 }
 0x23a   :  { %v811_v58 = vpop.f32.mrf.mxu0  ;;  %v852_v5 = vpop.f32.mrf.mxu1 }
 0x23b   :  { %v858_v13 = vadd.f32 %v811_v58, %v2839_v7  ;;  %v872_v20 = vadd.f32 %v2893_v3, %v852_v5 }
 0x23c   :  { %v813_v14 = vpop.f32.mrf.mxu0  ;;  %v2090_v21 = vpop.f32.mrf.mxu1 }
 0x23d   :  { %v1895_v28 = vmul.f32 -1.442695, %v858_v13  ;;  %v865_v59 = vadd.f32 %v813_v14, %v2841_v9 }
 0x23e   :  { %v815_v63 = vpop.f32.mrf.mxu0  ;;  %v855_v38 = vpop.f32.mrf.mxu1 }
 0x23f   :  { %2361 = vpow2.f32 %v1895_v28  ;;  %v1896_v6 = vmul.f32 -1.442695, %v865_v59 }
 0x240   :  { %v816_v0 = vpop.f32.mrf.mxu0  ;;  %v2091_v2 = vpop.f32.mrf.mxu1 }
 0x241   :  { %2363 = vpow2.f32 %v1896_v6 }
 0x24c   :  { %v2362_v11 = vpop.eup %2361 }
 0x24d   :  { %v862_v17 = vadd.f32 1.0, %v2362_v11 }
 0x24e   :  { %v2364_v25 = vpop.eup %2363 }
 0x24f   :  { %2365 = vrcp.f32 %v862_v17  ;;  %v869_v41 = vadd.f32 1.0, %v2364_v25 }
 0x251   :  { %2367 = vrcp.f32 %v869_v41 }
 0x25c   :  { %v2366_v7 = vpop.eup %2365 }
 0x25d   :  { %v873_v45 = vmul.f32 %v2366_v7, %v872_v20 }
 0x25e   :  { %v2368_v53 = vpop.eup %2367 }
 0x25f   :  { %v874_v4 = vadd.f32 %v873_v45, %v2862_v39  ;;  %v876_v58 = vsub.f32 1.0, %v2368_v53  ;;  %v878_v9 = vmul.f32 %v2368_v53, %v2898_v60  ;;  %v1115_v39 = vsel %vm1114_vm4, 1, %v3258_v18 }
 0x260   :  { %1117 = vperm.xlu1 %2266, %v1115_v39  }
 0x261   :  { %2369 = vtanh.f32 %v874_v4 }
 0x26e   :  { %v2370_v13 = vpop.eup %2369 }
 0x26f   :  { %v877_v21 = vmul.f32 %v2370_v13, %v876_v58 }
 0x271   :  { %v2944_v14 = vadd.f32 %v878_v9, %v877_v21 }
 0x273   :  { %v892_v28 = vpack.c.bf16 %v2944_v14, %v2944_v14 }
 0x275   :  { %926 = vmatmul.mubr.bf16.vlgmr.msra.gmra.mxu0 %v892_v28  ;;  %2109 = vmatmul.mubr.bf16.vlgmr.msra.gmra.mxu1 %v892_v28 }
 0x276   :  { %1010 = vmatpush1.bf16.msra.mxu0 %v2698_v26  ;;  %2113 = vmatpush3.bf16.msra.mxu1 %v2718_v35 }
 0x277   :  { %1011 = vmatprep.subr.bf16.mxu0 %v2701_v27  ;;  %2114 = vmatprep.subr.bf16.mxu1 %v3257_v10 }
 0x278   :  { %1041 = vmatprep.mubr.bf16.mxu0 %v3258_v18  ;;  %2128 = vmatprep.mubr.msk.bf16.mxu1 %vm2601_vm1, %v3257_v10 }
 0x27a   :  { %1012 = vmatpush1.bf16.msra.mxu0 %v2704_v29  ;;  %2115 = vmatpush3.bf16.msra.mxu1 %v2731_v40 }
 0x27b   :  { %1013 = vmatprep.subr.bf16.mxu0 %v2708_v30  ;;  %2116 = vmatprep.subr.bf16.mxu1 %v3257_v10 }
 0x27e   :  { %1014 = vmatpush1.bf16.msra.mxu0 %v2711_v32  ;;  %2117 = vmatpush3.bf16.msra.mxu1 %v2742_v44 }
 0x27f   :  { %1015 = vmatprep.subr.bf16.mxu0 %v2714_v33  ;;  %2118 = vmatprep.subr.bf16.mxu1 %v3257_v10 }
 0x282   :  { %1016 = vmatpush1.bf16.msra.mxu0 %v2716_v34  ;;  %2119 = vmatpush3.bf16.msra.mxu1 %v2755_v48 }
 0x283   :  { %1017 = vmatprep.subr.bf16.mxu0 %v2725_v37  ;;  %2120 = vmatprep.subr.bf16.mxu1 %v3257_v10 }
 0x286   :  { %1018 = vmatpush1.bf16.msra.mxu0 %v2735_v42  ;;  %2121 = vmatpush3.bf16.msra.mxu1 %v2767_v51 }
 0x287   :  { %1019 = vmatprep.subr.bf16.mxu0 %v2738_v43  ;;  %2122 = vmatprep.subr.bf16.mxu1 %v3257_v10 }
 0x28a   :  { %1020 = vmatpush1.bf16.msra.mxu0 %v2745_v46  ;;  %2123 = vmatpush3.bf16.msra.mxu1 %v2781_v54 }
 0x28b   :  { %1021 = vmatprep.subr.bf16.mxu0 %v2748_v47  ;;  %2124 = vmatprep.subr.bf16.mxu1 %v3257_v10 }
 0x28e   :  { %1022 = vmatpush1.bf16.msra.mxu0 %v2761_v49  ;;  %2125 = vmatpush3.bf16.msra.mxu1 %v2789_v56 }
 0x28f   :  { %1023 = vmatprep.subr.bf16.mxu0 %v2764_v50  ;;  %2126 = vmatprep.subr.bf16.mxu1 %v3257_v10 }
 0x292   :  { %1024 = vmatpush1.bf16.msra.mxu0 %v2771_v52  ;;  %2127 = vmatpush3.bf16.msra.mxu1 %v2796_v57 }
 0x293   :  { %1125 = vmatprep.subr.bf16.mxu0 %v2696_v24  ;;  %2132 = vmatprep.subr.bf16.mxu1 %v3257_v10 }
 0x335   :  { %v927_v5 = vpop.f32.mrf.mxu0  ;;  %v968_v63 = vpop.f32.mrf.mxu1 }
 0x336   :  { %v974_v38 = vadd.f32 %v927_v5, %v2845_v12  ;;  %v988_v58 = vadd.f32 %v2893_v3, %v968_v63 }
 0x337   :  { %v929_v0 = vpop.f32.mrf.mxu0  ;;  %v2110_v2 = vpop.f32.mrf.mxu1 }
 0x338   :  { %v1897_v59 = vmul.f32 -1.442695, %v974_v38  ;;  %v981_v41 = vadd.f32 %v929_v0, %v2847_v15 }
 0x339   :  { %v931_v6 = vpop.f32.mrf.mxu0  ;;  %v971_v11 = vpop.f32.mrf.mxu1 }
 0x33a   :  { %2371 = vpow2.f32 %v1897_v59  ;;  %v1898_v20 = vmul.f32 -1.442695, %v981_v41 }
 0x33b   :  { %v932_v17 = vpop.f32.mrf.mxu0  ;;  %v2111_v25 = vpop.f32.mrf.mxu1 }
 0x33c   :  { %2373 = vpow2.f32 %v1898_v20 }
 0x347   :  { %v2372_v7 = vpop.eup %2371 }
 0x348   :  { %v978_v45 = vadd.f32 1.0, %v2372_v7 }
 0x349   :  { %v2374_v4 = vpop.eup %2373 }
 0x34a   :  { %2375 = vrcp.f32 %v978_v45  ;;  %v985_v53 = vadd.f32 1.0, %v2374_v4 }
 0x34c   :  { %2377 = vrcp.f32 %v985_v53 }
 0x357   :  { %v2376_v12 = vpop.eup %2375 }
 0x358   :  { %v989_v13 = vmul.f32 %v2376_v12, %v988_v58 }
 0x359   :  { %v2378_v9 = vpop.eup %2377 }
 0x35a   :  { %v990_v21 = vadd.f32 %v989_v13, %v2850_v16  ;;  %v992_v28 = vsub.f32 1.0, %v2378_v9  ;;  %v994_v15 = vmul.f32 %v2378_v9, %v2944_v14  ;;  %v1231_v16 = vsel %vm1230_vm5, 1, %v3258_v18 }
 0x35b   :  { %1233 = vperm.xlu0 %2265, %v1231_v16  }
 0x35c   :  { %2379 = vtanh.f32 %v990_v21 }
 0x369   :  { %v2380_v39 = vpop.eup %2379 }
 0x36a   :  { %v993_v5 = vmul.f32 %v2380_v39, %v992_v28 }
 0x36c   :  { %v2990_v38 = vadd.f32 %v994_v15, %v993_v5 }
 0x36e   :  { %v1008_v0 = vpack.c.bf16 %v2990_v38, %v2990_v38 }
 0x370   :  { %1042 = vmatmul.mubr.bf16.vlgmr.msra.gmra.mxu0 %v1008_v0  ;;  %2129 = vmatmul.mubr.bf16.vlgmr.msra.gmra.mxu1 %v1008_v0 }
 0x371   :  { %1126 = vmatpush1.bf16.msra.mxu0 %v2698_v26  ;;  %2133 = vmatpush3.bf16.msra.mxu1 %v2718_v35 }
 0x372   :  { %1127 = vmatprep.subr.bf16.mxu0 %v2701_v27  ;;  %2134 = vmatprep.subr.bf16.mxu1 %v3257_v10 }
 0x373   :  { %1157 = vmatprep.mubr.bf16.mxu0 %v3258_v18  ;;  %2148 = vmatprep.mubr.msk.bf16.mxu1 %vm2601_vm1, %v3257_v10 }
 0x375   :  { %1128 = vmatpush1.bf16.msra.mxu0 %v2704_v29  ;;  %2135 = vmatpush3.bf16.msra.mxu1 %v2731_v40 }
 0x376   :  { %1129 = vmatprep.subr.bf16.mxu0 %v2708_v30  ;;  %2136 = vmatprep.subr.bf16.mxu1 %v3257_v10 }
 0x379   :  { %1130 = vmatpush1.bf16.msra.mxu0 %v2711_v32  ;;  %2137 = vmatpush3.bf16.msra.mxu1 %v2742_v44 }
 0x37a   :  { %1131 = vmatprep.subr.bf16.mxu0 %v2714_v33  ;;  %2138 = vmatprep.subr.bf16.mxu1 %v3257_v10 }
 0x37d   :  { %1132 = vmatpush1.bf16.msra.mxu0 %v2716_v34  ;;  %2139 = vmatpush3.bf16.msra.mxu1 %v2755_v48 }
 0x37e   :  { %1133 = vmatprep.subr.bf16.mxu0 %v2725_v37  ;;  %2140 = vmatprep.subr.bf16.mxu1 %v3257_v10 }
 0x381   :  { %1134 = vmatpush1.bf16.msra.mxu0 %v2735_v42  ;;  %2141 = vmatpush3.bf16.msra.mxu1 %v2767_v51 }
 0x382   :  { %1135 = vmatprep.subr.bf16.mxu0 %v2738_v43  ;;  %2142 = vmatprep.subr.bf16.mxu1 %v3257_v10 }
 0x385   :  { %1136 = vmatpush1.bf16.msra.mxu0 %v2745_v46  ;;  %2143 = vmatpush3.bf16.msra.mxu1 %v2781_v54 }
 0x386   :  { %1137 = vmatprep.subr.bf16.mxu0 %v2748_v47  ;;  %2144 = vmatprep.subr.bf16.mxu1 %v3257_v10 }
 0x389   :  { %1138 = vmatpush1.bf16.msra.mxu0 %v2761_v49  ;;  %2145 = vmatpush3.bf16.msra.mxu1 %v2789_v56 }
 0x38a   :  { %1139 = vmatprep.subr.bf16.mxu0 %v2764_v50  ;;  %2146 = vmatprep.subr.bf16.mxu1 %v3257_v10 }
 0x38d   :  { %1140 = vmatpush1.bf16.msra.mxu0 %v2771_v52  ;;  %2147 = vmatpush3.bf16.msra.mxu1 %v2796_v57 }
 0x38e   :  { %1241 = vmatprep.subr.bf16.mxu0 %v2696_v24  ;;  %2152 = vmatprep.subr.bf16.mxu1 %v3257_v10 }
 0x430   :  { %v1043_v63 = vpop.f32.mrf.mxu0  ;;  %v1084_v2 = vpop.f32.mrf.mxu1 }
 0x431   :  { %v1090_v59 = vadd.f32 %v1043_v63, %v2852_v19  ;;  %v1104_v13 = vadd.f32 %v2893_v3, %v1084_v2 }
 0x432   :  { %v1045_v6 = vpop.f32.mrf.mxu0  ;;  %v2130_v11 = vpop.f32.mrf.mxu1 }
 0x433   :  { %v1899_v17 = vmul.f32 -1.442695, %v1090_v59  ;;  %v1097_v24 = vadd.f32 %v1045_v6, %v2854_v22 }
 0x434   :  { %v1047_v25 = vpop.f32.mrf.mxu0  ;;  %v1087_v41 = vpop.f32.mrf.mxu1 }
 0x435   :  { %2381 = vpow2.f32 %v1899_v17  ;;  %v1900_v45 = vmul.f32 -1.442695, %v1097_v24 }
 0x436   :  { %v1048_v20 = vpop.f32.mrf.mxu0  ;;  %v2131_v7 = vpop.f32.mrf.mxu1 }
 0x437   :  { %2383 = vpow2.f32 %v1900_v45 }
 0x442   :  { %v2382_v4 = vpop.eup %2381 }
 0x443   :  { %v1094_v53 = vadd.f32 1.0, %v2382_v4 }
 0x444   :  { %v2384_v58 = vpop.eup %2383 }
 0x445   :  { %2385 = vrcp.f32 %v1094_v53  ;;  %v1101_v12 = vadd.f32 1.0, %v2384_v58 }
 0x447   :  { %2387 = vrcp.f32 %v1101_v12 }
 0x452   :  { %v2386_v19 = vpop.eup %2385 }
 0x453   :  { %v1105_v21 = vmul.f32 %v2386_v19, %v1104_v13  ;;  %v3088_v13 = vld [vmem:[#allocation10 + $0xa8] ss:$12 sps:$4 sm:$0xff]   ;;  %v3091_v19 = vld [vmem:[#allocation10 + $0xb0] ss:$12 sps:$4 sm:$0xff]  }
 0x454   :  { %v2388_v28 = vpop.eup %2387 }
 0x455   :  { %v1106_v9 = vadd.f32 %v1105_v21, %v2857_v23  ;;  %v1108_v39 = vsub.f32 1.0, %v2388_v28  ;;  %v1110_v22 = vmul.f32 %v2388_v28, %v2990_v38  ;;  %v3101_v21 = vld [vmem:[#allocation10 + $0x90] ss:$12 sps:$4 sm:$0xff]   ;;  %v3109_v28 = vld [vmem:[#allocation10 + $0x78] ss:$12 sps:$4 sm:$0xff]  }
 0x457   :  { %2389 = vtanh.f32 %v1106_v9  ;;  %v3105_v9 = vld [vmem:[#allocation10 + $0x7c] ss:$12 sps:$4 sm:$0xff]  }
 0x464   :  { %v2390_v5 = vpop.eup %2389 }
 0x465   :  { %v1109_v15 = vmul.f32 %v2390_v5, %v1108_v39  ;;  %v3113_v39 = vld [vmem:[#allocation10 + $0x64] ss:$12 sps:$4 sm:$0xff]   ;;  %v3117_v5 = vld [vmem:[#allocation10 + $0x60] ss:$12 sps:$4 sm:$0xff]  }
 0x467   :  { %v3036_v0 = vadd.f32 %v1110_v22, %v1109_v15 }
 0x469   :  { %v1124_v16 = vpack.c.bf16 %v3036_v0, %v3036_v0 }
 0x46b   :  { %1158 = vmatmul.mubr.bf16.vlgmr.msra.gmra.mxu0 %v1124_v16  ;;  %2149 = vmatmul.mubr.bf16.vlgmr.msra.gmra.mxu1 %v1124_v16 }
 0x46c   :  { %1242 = vmatpush1.bf16.msra.mxu0 %v2698_v26  ;;  %2153 = vmatpush3.bf16.msra.mxu1 %v2718_v35  ;;  %v3073_v26 = vld [vmem:[#allocation10 + $0xac] ss:$12 sps:$4 sm:$0xff]  }
 0x46d   :  { %1243 = vmatprep.subr.bf16.mxu0 %v2701_v27  ;;  %2154 = vmatprep.subr.bf16.mxu1 %v3257_v10  ;;  %v1347_v27 = vsel %vm1346_vm6, 1, %v3258_v18 }
 0x46e   :  { %1273 = vmatprep.mubr.bf16.mxu0 %v3258_v18  ;;  %2168 = vmatprep.mubr.msk.bf16.mxu1 %vm2601_vm1, %v3257_v10 }
 0x46f   :  { %1349 = vperm.xlu1 %2266, %v1347_v27  }
 0x470   :  { %1244 = vmatpush1.bf16.msra.mxu0 %v2704_v29  ;;  %2155 = vmatpush3.bf16.msra.mxu1 %v2731_v40 }
 0x471   :  { %1245 = vmatprep.subr.bf16.mxu0 %v2708_v30  ;;  %2156 = vmatprep.subr.bf16.mxu1 %v3257_v10 }
 0x474   :  { %1246 = vmatpush1.bf16.msra.mxu0 %v2711_v32  ;;  %2157 = vmatpush3.bf16.msra.mxu1 %v2742_v44 }
 0x475   :  { %1247 = vmatprep.subr.bf16.mxu0 %v2714_v33  ;;  %2158 = vmatprep.subr.bf16.mxu1 %v3257_v10 }
 0x478   :  { %1248 = vmatpush1.bf16.msra.mxu0 %v2716_v34  ;;  %2159 = vmatpush3.bf16.msra.mxu1 %v2755_v48 }
 0x479   :  { %1249 = vmatprep.subr.bf16.mxu0 %v2725_v37  ;;  %2160 = vmatprep.subr.bf16.mxu1 %v3257_v10 }
 0x47c   :  { %1250 = vmatpush1.bf16.msra.mxu0 %v2735_v42  ;;  %2161 = vmatpush3.bf16.msra.mxu1 %v2767_v51 }
 0x47d   :  { %1251 = vmatprep.subr.bf16.mxu0 %v2738_v43  ;;  %2162 = vmatprep.subr.bf16.mxu1 %v3257_v10 }
 0x480   :  { %1252 = vmatpush1.bf16.msra.mxu0 %v2745_v46  ;;  %2163 = vmatpush3.bf16.msra.mxu1 %v2781_v54 }
 0x481   :  { %1253 = vmatprep.subr.bf16.mxu0 %v2748_v47  ;;  %2164 = vmatprep.subr.bf16.mxu1 %v3257_v10 }
 0x484   :  { %1254 = vmatpush1.bf16.msra.mxu0 %v2761_v49  ;;  %2165 = vmatpush3.bf16.msra.mxu1 %v2789_v56 }
 0x485   :  { %1255 = vmatprep.subr.bf16.mxu0 %v2764_v50  ;;  %2166 = vmatprep.subr.bf16.mxu1 %v3257_v10 }
 0x488   :  { %1256 = vmatpush1.bf16.msra.mxu0 %v2771_v52  ;;  %2167 = vmatpush3.bf16.msra.mxu1 %v2796_v57 }
 0x489   :  { %1357 = vmatprep.subr.bf16.mxu0 %v3073_v26  ;;  %2172 = vmatprep.subr.bf16.mxu1 %v3257_v10 }
 0x52b   :  { %v1159_v29 = vpop.f32.mrf.mxu0  ;;  %v1200_v30 = vpop.f32.mrf.mxu1 }
 0x52c   :  { %v1206_v32 = vadd.f32 %v1159_v29, %v2859_v31  ;;  %v1220_v41 = vadd.f32 %v2893_v3, %v1200_v30 }
 0x52d   :  { %v1161_v33 = vpop.f32.mrf.mxu0  ;;  %v2150_v34 = vpop.f32.mrf.mxu1 }
 0x52e   :  { %v1901_v35 = vmul.f32 -1.442695, %v1206_v32  ;;  %v1213_v59 = vadd.f32 %v1161_v33, %v2864_v55  ;;  %v3259_v32 = vld [vmem:[#allocation22_spill] sm:$0xff] }
 0x52f   :  { %v1163_v37 = vpop.f32.mrf.mxu0  ;;  %v1203_v23 = vpop.f32.mrf.mxu1 }
 0x530   :  { %2391 = vpow2.f32 %v1901_v35  ;;  %v1902_v6 = vmul.f32 -1.442695, %v1213_v59  ;;  %v2446_v59 = vld [vmem:[#allocation10 + $0x98] ss:$12 sps:$4 sm:$0xff]  }
 0x531   :  { %v1164_v63 = vpop.f32.mrf.mxu0  ;;  %v2151_v2 = vpop.f32.mrf.mxu1 }
 0x532   :  { %2393 = vpow2.f32 %v1902_v6  ;;  %v2447_v6 = vld [vmem:[#allocation10 + $0x80] ss:$12 sps:$4 sm:$0xff]  }
 0x53d   :  { %v2392_v36 = vpop.eup %2391 }
 0x53e   :  { %v1210_v11 = vadd.f32 1.0, %v2392_v36  ;;  %v2448_v36 = vld [vmem:[#allocation10 + $0x68] ss:$12 sps:$4 sm:$0xff]  }
 0x53f   :  { %v2394_v17 = vpop.eup %2393 }
 0x540   :  { %2395 = vrcp.f32 %v1210_v11  ;;  %v1217_v25 = vadd.f32 1.0, %v2394_v17  ;;  %v2449_v11 = vld [vmem:[#allocation10 + $0x48] ss:$12 sps:$4 sm:$0xff]   ;;  %v2450_v17 = vld [vmem:[#allocation10 + $0x50] ss:$12 sps:$4 sm:$0xff]  }
 0x542   :  { %2397 = vrcp.f32 %v1217_v25  ;;  %v2451_v25 = vld [vmem:[#allocation10 + $0x34] ss:$12 sps:$4 sm:$0xff]  }
 0x54d   :  { %v2396_v31 = vpop.eup %2395 }
 0x54e   :  { %v1221_v20 = vmul.f32 %v2396_v31, %v1220_v41  ;;  %v2452_v41 = vld [vmem:[#allocation10 + $0x30] ss:$12 sps:$4 sm:$0xff]   ;;  %v2453_v31 = vld [vmem:[#allocation10 + $0x38] ss:$12 sps:$4 sm:$0xff]  }
 0x54f   :  { %v2398_v24 = vpop.eup %2397 }
 0x550   :  { %v1222_v7 = vadd.f32 %v1221_v20, %v2872_v1  ;;  %v1224_v45 = vsub.f32 1.0, %v2398_v24  ;;  %v1226_v55 = vmul.f32 %v2398_v24, %v3036_v0  ;;  %v3094_v1 = vld [vmem:[#allocation10 + $0x94] ss:$12 sps:$4 sm:$0xff]   ;;  %v2454_v20 = vld [vmem:[#allocation10 + $0x1c] ss:$12 sps:$4 sm:$0xff]  }
 0x551   :  { %v2456_v24 = vld [vmem:[#allocation10 + $0x20] ss:$12 sps:$4 sm:$0xff]  }
 0x552   :  { %2399 = vtanh.f32 %v1222_v7  ;;  %v2455_v7 = vld [vmem:[#allocation10 + $0x18] ss:$12 sps:$4 sm:$0xff]  }
 0x55f   :  { %v2400_v4 = vpop.eup %2399 }
 0x560   :  { %v1225_v53 = vmul.f32 %v2400_v4, %v1224_v45  ;;  %v2457_v45 = vld [vmem:[#allocation10 + $0x4] ss:$12 sps:$4 sm:$0xff]   ;;  %v2458_v4 = vld [vmem:[#allocation10] ss:$12 sps:$4 sm:$0xff]  }
 0x562   :  { %v3084_v58 = vadd.f32 %v1226_v55, %v1225_v53  ;;  %v2459_v53 = vld [vmem:[#allocation10 + $0x8] ss:$12 sps:$4 sm:$0xff]  }
 0x564   :  { %v1240_v12 = vpack.c.bf16 %v3084_v58, %v3084_v58 }
 0x566   :  { %1274 = vmatmul.mubr.bf16.vlgmr.msra.gmra.mxu0 %v1240_v12  ;;  %2169 = vmatmul.mubr.bf16.vlgmr.msra.gmra.mxu1 %v1240_v12 }
 0x567   :  { %1358 = vmatpush1.bf16.msra.mxu0 %v3088_v13  ;;  %2173 = vmatpush3.bf16.msra.mxu1 %v3091_v19 }
 0x568   :  { %1359 = vmatprep.subr.bf16.mxu0 %v3094_v1  ;;  %2174 = vmatprep.subr.bf16.mxu1 %v3257_v10 }
 0x569   :  { %1389 = vmatprep.mubr.bf16.mxu0 %v3258_v18  ;;  %2188 = vmatprep.mubr.msk.bf16.mxu1 %vm2601_vm1, %v3257_v10 }
 0x56b   :  { %1360 = vmatpush1.bf16.msra.mxu0 %v3101_v21  ;;  %2175 = vmatpush3.bf16.msra.mxu1 %v2731_v40  ;;  %v3121_v40 = vld [vmem:[#allocation10 + $0x4c] ss:$12 sps:$4 sm:$0xff]  }
 0x56c   :  { %1361 = vmatprep.subr.bf16.mxu0 %v3105_v9  ;;  %2176 = vmatprep.subr.bf16.mxu1 %v3257_v10 }
 0x56f   :  { %1362 = vmatpush1.bf16.msra.mxu0 %v3109_v28  ;;  %2177 = vmatpush3.bf16.msra.mxu1 %v2742_v44 }
 0x570   :  { %1363 = vmatprep.subr.bf16.mxu0 %v3113_v39  ;;  %2178 = vmatprep.subr.bf16.mxu1 %v3257_v10 }
 0x573   :  { %1364 = vmatpush1.bf16.msra.mxu0 %v3117_v5  ;;  %2179 = vmatpush3.bf16.msra.mxu1 %v2755_v48 }
 0x574   :  { %1365 = vmatprep.subr.bf16.mxu0 %v3121_v40  ;;  %2180 = vmatprep.subr.bf16.mxu1 %v3257_v10 }
 0x577   :  { %1366 = vmatpush1.bf16.msra.mxu0 %v2735_v42  ;;  %2181 = vmatpush3.bf16.msra.mxu1 %v2767_v51  ;;  %v3144_v42 = vld [vmem:[%s3235_s1] sm:$0xff] }
 0x578   :  { %1367 = vmatprep.subr.bf16.mxu0 %v2738_v43  ;;  %2182 = vmatprep.subr.bf16.mxu1 %v3257_v10  ;;  %vm1462_vm7 = vcmp.eq.s32.totalorder %v3144_v42, 6  ;;  %vm1578_vm8 = vcmp.eq.s32.totalorder %v3144_v42, 7 }
 0x579   :  { %v1463_v43 = vsel %vm1462_vm7, 1, %v3258_v18  ;;  %v1579_v55 = vsel %vm1578_vm8, 1, %v3258_v18 }
 0x57a   :  { %1465 = vperm.xlu0 %2265, %v1463_v43   ;;  %1581 = vperm.xlu1 %2266, %v1579_v55  }
 0x57b   :  { %1368 = vmatpush1.bf16.msra.mxu0 %v2745_v46  ;;  %2183 = vmatpush3.bf16.msra.mxu1 %v2781_v54 }
 0x57c   :  { %1369 = vmatprep.subr.bf16.mxu0 %v2748_v47  ;;  %2184 = vmatprep.subr.bf16.mxu1 %v3257_v10 }
 0x57f   :  { %1370 = vmatpush1.bf16.msra.mxu0 %v2761_v49  ;;  %2185 = vmatpush3.bf16.msra.mxu1 %v2789_v56 }
 0x580   :  { %1371 = vmatprep.subr.bf16.mxu0 %v2764_v50  ;;  %2186 = vmatprep.subr.bf16.mxu1 %v3257_v10 }
 0x583   :  { %1372 = vmatpush1.bf16.msra.mxu0 %v2771_v52  ;;  %2187 = vmatpush3.bf16.msra.mxu1 %v2796_v57 }
 0x584   :  { %1473 = vmatprep.subr.bf16.mxu0 %v3073_v26  ;;  %2192 = vmatprep.subr.bf16.mxu1 %v3257_v10 }
 0x626   :  { %v1275_v44 = vpop.f32.mrf.mxu0  ;;  %v1316_v46 = vpop.f32.mrf.mxu1 }
 0x627   :  { %v1322_v47 = vadd.f32 %v1275_v44, %v2869_v62  ;;  %v1336_v29 = vadd.f32 %v2893_v3, %v1316_v46  ;;  %v3261_v44 = vld [vmem:[#allocation23_spill] sm:$0xff] }
 0x628   :  { %v1277_v48 = vpop.f32.mrf.mxu0  ;;  %v2170_v49 = vpop.f32.mrf.mxu1 }
 0x629   :  { %v1903_v50 = vmul.f32 -1.442695, %v1322_v47  ;;  %v1329_v57 = vadd.f32 %v1277_v48, %v2874_v8 }
 0x62a   :  { %v1279_v51 = vpop.f32.mrf.mxu0  ;;  %v1319_v52 = vpop.f32.mrf.mxu1 }
 0x62b   :  { %2401 = vpow2.f32 %v1903_v50  ;;  %v1904_v15 = vmul.f32 -1.442695, %v1329_v57 }
 0x62c   :  { %v1280_v54 = vpop.f32.mrf.mxu0  ;;  %v2171_v56 = vpop.f32.mrf.mxu1 }
 0x62d   :  { %2403 = vpow2.f32 %v1904_v15  ;;  %v3262_v54 = vld [vmem:[#allocation19_spill] sm:$0xff] }
 0x638   :  { %v2402_v22 = vpop.eup %2401 }
 0x639   :  { %v1326_v16 = vadd.f32 1.0, %v2402_v22 }
 0x63a   :  { %v2404_v26 = vpop.eup %2403 }
 0x63b   :  { %2405 = vrcp.f32 %v1326_v16  ;;  %v1333_v27 = vadd.f32 1.0, %v2404_v26 }
 0x63d   :  { %2407 = vrcp.f32 %v1333_v27 }
 0x648   :  { %v2406_v62 = vpop.eup %2405 }
 0x649   :  { %v1337_v30 = vmul.f32 %v2406_v62, %v1336_v29  ;;  %v2336_v62 = vld [vmem:[#allocation13 + $0x30] sm:$0xff]  }
 0x64a   :  { %v2408_v34 = vpop.eup %2407 }
 0x64b   :  { %v1338_v33 = vadd.f32 %v1337_v30, %v3259_v32  ;;  %v1340_v35 = vsub.f32 1.0, %v2408_v34  ;;  %v1342_v8 = vmul.f32 %v2408_v34, %v3084_v58  ;;  %v2337_v30 = vld [vmem:[#allocation11 + $0x38] sm:$0xff]   ;;  %v2338_v32 = vld [vmem:[#allocation13 + $0x28] sm:$0xff]   ;;  %v2340_v34 = vld [vmem:[#allocation13 + $0x20] sm:$0xff]  }
 0x64d   :  { %2409 = vtanh.f32 %v1338_v33  ;;  %v2339_v33 = vld [vmem:[#allocation11 + $0x30] sm:$0xff]  }
 0x65a   :  { %v2410_v37 = vpop.eup %2409 }
 0x65b   :  { %v1341_v23 = vmul.f32 %v2410_v37, %v1340_v35  ;;  %v2341_v35 = vld [vmem:[#allocation11 + $0x28] sm:$0xff]   ;;  %v2342_v37 = vld [vmem:[#allocation13 + $0x18] sm:$0xff]  }
 0x65d   :  { %v3153_v63 = vadd.f32 %v1342_v8, %v1341_v23  ;;  %v2343_v23 = vld [vmem:[#allocation11 + $0x20] sm:$0xff]   ;;  %v2344_v8 = vld [vmem:[#allocation13 + $0x10] sm:$0xff]  }
 0x65f   :  { %v1356_v2 = vpack.c.bf16 %v3153_v63, %v3153_v63 }
 0x661   :  { %1390 = vmatmul.mubr.bf16.vlgmr.msra.gmra.mxu0 %v1356_v2  ;;  %2189 = vmatmul.mubr.bf16.vlgmr.msra.gmra.mxu1 %v1356_v2  ;;  %v2345_v2 = vld [vmem:[#allocation11 + $0x18] sm:$0xff]  }
 0x662   :  { %1474 = vmatpush1.bf16.msra.mxu0 %v3088_v13  ;;  %2193 = vmatpush3.bf16.msra.mxu1 %v3091_v19  ;;  %v3260_v19 = vld [vmem:[#allocation21_spill] sm:$0xff] }
 0x663   :  { %1475 = vmatprep.subr.bf16.mxu0 %v3094_v1  ;;  %2194 = vmatprep.subr.bf16.mxu1 %v3257_v10 }
 0x664   :  { %1505 = vmatprep.mubr.bf16.mxu0 %v3258_v18  ;;  %2208 = vmatprep.mubr.msk.bf16.mxu1 %vm2601_vm1, %v3257_v10 }
 0x666   :  { %1476 = vmatpush1.bf16.msra.mxu0 %v3101_v21  ;;  %2195 = vmatpush3.bf16.msra.mxu1 %v2446_v59  ;;  %v2346_v59 = vld [vmem:[#allocation13 + $0x8] sm:$0xff]  }
 0x667   :  { %1477 = vmatprep.subr.bf16.mxu0 %v3105_v9  ;;  %2196 = vmatprep.subr.bf16.mxu1 %v3257_v10 }
 0x66a   :  { %1478 = vmatpush1.bf16.msra.mxu0 %v3109_v28  ;;  %2197 = vmatpush3.bf16.msra.mxu1 %v2447_v6  ;;  %v2347_v6 = vld [vmem:[#allocation11 + $0x10] sm:$0xff]  }
 0x66b   :  { %1479 = vmatprep.subr.bf16.mxu0 %v3113_v39  ;;  %2198 = vmatprep.subr.bf16.mxu1 %v3257_v10 }
 0x66e   :  { %1480 = vmatpush1.bf16.msra.mxu0 %v3117_v5  ;;  %2199 = vmatpush3.bf16.msra.mxu1 %v2448_v36  ;;  %v2348_v36 = vld [vmem:[#allocation13] sm:$0xff]  }
 0x66f   :  { %1481 = vmatprep.subr.bf16.mxu0 %v3121_v40  ;;  %2200 = vmatprep.subr.bf16.mxu1 %v3257_v10 }
 0x672   :  { %1482 = vmatpush1.bf16.msra.mxu0 %v2449_v11  ;;  %2201 = vmatpush3.bf16.msra.mxu1 %v2450_v17  ;;  %v2349_v11 = vld [vmem:[#allocation11 + $0x8] sm:$0xff]   ;;  %v1607_v17 = vld [vmem:[%s3236_s2] sm:$0xf] }
 0x673   :  { %1483 = vmatprep.subr.bf16.mxu0 %v2451_v25  ;;  %2202 = vmatprep.subr.bf16.mxu1 %v3257_v10  ;;  %v2350_v25 = vld [vmem:[#allocation11] sm:$0xff]  }
 0x676   :  { %1484 = vmatpush1.bf16.msra.mxu0 %v2452_v41  ;;  %2203 = vmatpush3.bf16.msra.mxu1 %v2453_v31 }
 0x677   :  { %1485 = vmatprep.subr.bf16.mxu0 %v2454_v20  ;;  %2204 = vmatprep.subr.bf16.mxu1 %v3257_v10  ;;  %v3263_v20 = vld [vmem:[#allocation24_spill] sm:$0xff] }
 0x67a   :  { %1486 = vmatpush1.bf16.msra.mxu0 %v2455_v7  ;;  %2205 = vmatpush3.bf16.msra.mxu1 %v2456_v24 }
 0x67b   :  { %1487 = vmatprep.subr.bf16.mxu0 %v2457_v45  ;;  %2206 = vmatprep.subr.bf16.mxu1 %v3257_v10 }
 0x67e   :  { %1488 = vmatpush1.bf16.msra.mxu0 %v2458_v4  ;;  %2207 = vmatpush3.bf16.msra.mxu1 %v2459_v53 }
 0x67f   :  { %2212 = vmatprep.subr.bf16.mxu0 %v3257_v10  ;;  %2232 = vmatprep.subr.bf16.mxu1 %v3257_v10 }
 0x721   :  { %v1391_v12 = vpop.f32.mrf.mxu0  ;;  %v1432_v13 = vpop.f32.mrf.mxu1 }
 0x722   :  { %v1438_v1 = vadd.f32 %v1391_v12, %v3260_v19  ;;  %v1452_v50 = vadd.f32 %v2893_v3, %v1432_v13  ;;  %v2335_v3 = vld [vmem:[#allocation13 + $0x38] sm:$0xff]  }
 0x723   :  { %v1393_v21 = vpop.f32.mrf.mxu0  ;;  %v2190_v9 = vpop.f32.mrf.mxu1 }
 0x724   :  { %v1905_v28 = vmul.f32 -1.442695, %v1438_v1  ;;  %v1445_v46 = vadd.f32 %v1393_v21, %v3261_v44  ;;  %v3264_v44 = vld [vmem:[#allocation20_spill] sm:$0xff] }
 0x725   :  { %v1395_v39 = vpop.f32.mrf.mxu0  ;;  %v1435_v5 = vpop.f32.mrf.mxu1 }
 0x726   :  { %2411 = vpow2.f32 %v1905_v28  ;;  %v1906_v47 = vmul.f32 -1.442695, %v1445_v46  ;;  %v2460_v39 = vld [vmem:[%s3241_s7] ss:$0 sm:$0xff] }
 0x727   :  { %v1396_v40 = vpop.f32.mrf.mxu0  ;;  %v2191_v43 = vpop.f32.mrf.mxu1 }
 0x728   :  { %2413 = vpow2.f32 %v1906_v47  ;;  %v770_v47 = vpop.permute.xlu0 %769 }
 0x729   :  { %vm771_vm9 = vcmp.eq.s32.totalorder %v770_v47, 1 }
 0x733   :  { %v2412_v42 = vpop.eup %2411 }
 0x734   :  { %v1442_v48 = vadd.f32 1.0, %v2412_v42  ;;  %v886_v42 = vpop.permute.xlu0 %885 }
 0x735   :  { %v2414_v18 = vpop.eup %2413  ;;  %vm887_vm10 = vcmp.eq.s32.totalorder %v886_v42, 1 }
 0x736   :  { %2415 = vrcp.f32 %v1442_v48  ;;  %v1449_v49 = vadd.f32 1.0, %v2414_v18 }
 0x738   :  { %2417 = vrcp.f32 %v1449_v49  ;;  %v1234_v18 = vpop.permute.xlu0 %1233 }
 0x739   :  { %vm1235_vm13 = vcmp.eq.s32.totalorder %v1234_v18, 1 }
 0x743   :  { %v2416_v51 = vpop.eup %2415 }
 0x744   :  { %v1453_v52 = vmul.f32 %v2416_v51, %v1452_v50  ;;  %v2461_v51 = vld [vmem:[%s3237_s3] sm:$0xff] }
 0x745   :  { %v2418_v57 = vpop.eup %2417 }
 0x746   :  { %v1454_v56 = vadd.f32 %v1453_v52, %v3262_v54  ;;  %v1456_v15 = vsub.f32 1.0, %v2418_v57  ;;  %v1458_v26 = vmul.f32 %v2418_v57, %v3153_v63  ;;  %v772_v52 = vsel %vm771_vm9, %v2898_v60, %v2461_v51  ;;  %v1466_v54 = vpop.permute.xlu0 %1465 }
 0x747   :  { %vm1467_vm15 = vcmp.eq.s32.totalorder %v1466_v54, 1 }
 0x748   :  { %2419 = vtanh.f32 %v1454_v56  ;;  %v888_v56 = vsel %vm887_vm10, %v2944_v14, %v772_v52 }
 0x755   :  { %v2420_v22 = vpop.eup %2419 }
 0x756   :  { %v1457_v16 = vmul.f32 %v2420_v22, %v1456_v15 }
 0x758   :  { %v3185_v27 = vadd.f32 %v1458_v26, %v1457_v16 }
 0x75a   :  { %v1472_v29 = vpack.c.bf16 %v3185_v27, %v3185_v27 }
 0x75c   :  { %1506 = vmatmul.mubr.bf16.vlgmr.msra.gmra.mxu0 %v1472_v29  ;;  %2209 = vmatmul.mubr.bf16.vlgmr.msra.gmra.mxu1 %v1472_v29 }
 0x75d   :  { %2228 = vmatprep.mubr.msk.bf16.mxu0 %vm2601_vm1, %v3257_v10  ;;  %2248 = vmatprep.mubr.msk.bf16.mxu1 %vm2601_vm1, %v3257_v10 }
 0x75e   :  { %2213 = vmatpush3.bf16.msra.mxu0 %v2335_v3  ;;  %2233 = vmatpush3.bf16.msra.mxu1 %v2337_v30 }
 0x75f   :  { %2214 = vmatprep.subr.bf16.mxu0 %v3257_v10  ;;  %2234 = vmatprep.subr.bf16.mxu1 %v3257_v10 }
 0x762   :  { %2215 = vmatpush3.bf16.msra.mxu0 %v2336_v62  ;;  %2235 = vmatpush3.bf16.msra.mxu1 %v2339_v33 }
 0x763   :  { %2216 = vmatprep.subr.bf16.mxu0 %v3257_v10  ;;  %2236 = vmatprep.subr.bf16.mxu1 %v3257_v10 }
 0x766   :  { %2217 = vmatpush3.bf16.msra.mxu0 %v2338_v32  ;;  %2237 = vmatpush3.bf16.msra.mxu1 %v2341_v35 }
 0x767   :  { %2218 = vmatprep.subr.bf16.mxu0 %v3257_v10  ;;  %2238 = vmatprep.subr.bf16.mxu1 %v3257_v10 }
 0x76a   :  { %2219 = vmatpush3.bf16.msra.mxu0 %v2340_v34  ;;  %2239 = vmatpush3.bf16.msra.mxu1 %v2343_v23 }
 0x76b   :  { %2220 = vmatprep.subr.bf16.mxu0 %v3257_v10  ;;  %2240 = vmatprep.subr.bf16.mxu1 %v3257_v10 }
 0x76e   :  { %2221 = vmatpush3.bf16.msra.mxu0 %v2342_v37  ;;  %2241 = vmatpush3.bf16.msra.mxu1 %v2345_v2  ;;  %v3265_v37 = vlaneseq }
 0x76f   :  { %2222 = vmatprep.subr.bf16.mxu0 %v3257_v10  ;;  %2242 = vmatprep.subr.bf16.mxu1 %v3257_v10 }
 0x770   :  { %v1809_v23 = vand.u32 127, %v3265_v37 }
 0x772   :  { %2223 = vmatpush3.bf16.msra.mxu0 %v2344_v8  ;;  %2243 = vmatpush3.bf16.msra.mxu1 %v2347_v6  ;;  %vm1810_vm1 = vcmp.lt.s32.totalorder %v1809_v23, 10 }
 0x773   :  { %2224 = vmatprep.subr.bf16.mxu0 %v3257_v10  ;;  %2244 = vmatprep.subr.bf16.mxu1 %v3257_v10 }
 0x776   :  { %2225 = vmatpush3.bf16.msra.mxu0 %v2346_v59  ;;  %2245 = vmatpush3.bf16.msra.mxu1 %v2349_v11 }
 0x777   :  { %2226 = vmatprep.subr.bf16.mxu0 %v3257_v10  ;;  %2246 = vmatprep.subr.bf16.mxu1 %v3257_v10 }
 0x77a   :  { %2227 = vmatpush3.bf16.msra.mxu0 %v2348_v36  ;;  %2247 = vmatpush3.bf16.msra.mxu1 %v2350_v25 }
 0x77d   :  { %2229 = vmatmul.mubr.bf16.vlgmr.msra.gmra.mxu0 %v1607_v17 }
 0x81c   :  { %v1507_v41 = vpop.f32.mrf.mxu0  ;;  %v1548_v31 = vpop.f32.mrf.mxu1 }
 0x81d   :  { %v1554_v7 = vadd.f32 %v1507_v41, %v3263_v20  ;;  %v1568_v5 = vadd.f32 %v2460_v39, %v1548_v31 }
 0x81e   :  { %v1509_v24 = vpop.f32.mrf.mxu0  ;;  %v2210_v45 = vpop.f32.mrf.mxu1 }
 0x81f   :  { %v1907_v4 = vmul.f32 -1.442695, %v1554_v7  ;;  %v1561_v19 = vadd.f32 %v1509_v24, %v2888_v61  ;;  %v1002_v61 = vpop.permute.xlu1 %1001 }
 0x820   :  { %v1511_v53 = vpop.f32.mrf.mxu0  ;;  %v1551_v55 = vpop.f32.mrf.mxu1  ;;  %vm1003_vm11 = vcmp.eq.s32.totalorder %v1002_v61, 1 }
 0x821   :  { %2421 = vpow2.f32 %v1907_v4  ;;  %v1908_v1 = vmul.f32 -1.442695, %v1561_v19  ;;  %v1004_v22 = vsel %vm1003_vm11, %v2990_v38, %v888_v56 }
 0x822   :  { %v1512_v12 = vpop.f32.mrf.mxu0  ;;  %v2211_v13 = vpop.f32.mrf.mxu1 }
 0x823   :  { %2423 = vpow2.f32 %v1908_v1  ;;  %v1118_v48 = vpop.permute.xlu1 %1117 }
 0x824   :  { %vm1119_vm12 = vcmp.eq.s32.totalorder %v1118_v48, 1 }
 0x825   :  { %v1120_v16 = vsel %vm1119_vm12, %v3036_v0, %v1004_v22 }
 0x826   :  { %v1236_v62 = vsel %vm1235_vm13, %v3084_v58, %v1120_v16  ;;  %v1925_v58 = vld [vmem:[%s3244_s10] ss:$0 sm:$0xff]  ;;  %s2562_s10 = scalar_lea.vmem %s1830_s16, 128 }
 0x827   :  { %v1350_v50 = vpop.permute.xlu1 %1349  ;;  %p2563_p11 = scmp.ne.s32.totalorder %s1830_s16, %s2562_s10  ;;  %p2568_p13 = scmp.lt.s32.totalorder %s2562_s10, %s2562_s10 }
 0x828   :  { %vm1351_vm14 = vcmp.eq.s32.totalorder %v1350_v50, 1 }
 0x829   :  { %v1352_v60 = vsel %vm1351_vm14, %v3153_v63, %v1236_v62  ;;  %p2569_p0 = por %p2568_p13, %p2567_p12 }
 0x82a   :  { %v1468_v14 = vsel %vm1467_vm15, %v3185_v27, %v1352_v60 }
 0x82b   :  { %v1582_v26 = vpop.permute.xlu1 %1581  ;;  %p2570_p1 = pnand %p2569_p0, %p2563_p11 }
 0x82c   :  { %vm1583_vm0 = vcmp.eq.s32.totalorder %v1582_v26, 1 }
 0x82e   :  { %v2422_v21 = vpop.eup %2421 }
 0x82f   :  { %v1558_v10 = vadd.f32 1.0, %v2422_v21 }
 0x830   :  { %v2424_v9 = vpop.eup %2423 }
 0x831   :  { %2425 = vrcp.f32 %v1558_v10  ;;  %v1565_v28 = vadd.f32 1.0, %v2424_v9 }
 0x833   :  { %2427 = vrcp.f32 %v1565_v28 }
 0x83d   :  { %v1706_v38 = vpop.f32.mrf.mxu0 }
 0x83e   :  { %v2426_v40 = vpop.eup %2425 }
 0x83f   :  { %v1569_v43 = vmul.f32 %v2426_v40, %v1568_v5  ;;  %v2230_v34 = vpop.f32.mrf.mxu0 }
 0x840   :  { %v2428_v49 = vpop.eup %2427 }
 0x841   :  { %v1570_v46 = vadd.f32 %v1569_v43, %v3264_v44  ;;  %v1572_v57 = vsub.f32 1.0, %v2428_v49  ;;  %v1574_v3 = vmul.f32 %v2428_v49, %v3185_v27  ;;  %v1709_v35 = vpop.f32.mrf.mxu0 }
 0x843   :  { %2429 = vtanh.f32 %v1570_v46  ;;  %v2231_v0 = vpop.f32.mrf.mxu0 }
 0x850   :  { %v2430_v15 = vpop.eup %2429 }
 0x851   :  { %v1573_v29 = vmul.f32 %v2430_v15, %v1572_v57 }
 0x853   :  { %v1575_v30 = vadd.f32 %v1574_v3, %v1573_v29 }
 0x855   :  { %v1584_v32 = vsel %vm1583_vm0, %v1575_v30, %v1468_v14 }
 0x856   :  { %v1590_v33 = vpack.c.bf16 %v1584_v32, %v1584_v32 }
 0x858   :  { %2249 = vmatmul.mubr.bf16.vlgmr.msra.gmra.mxu1 %v1590_v33 }
 0x918   :  { %v1794_v8 = vpop.f32.mrf.mxu1 }
 0x919   :  { %v1795_v2 = vadd.f32 %v1794_v8, %v1706_v38 }
 0x91a   :  { %v2250_v63 = vpop.f32.mrf.mxu1 }
 0x91b   :  { %v1807_v59 = vadd.f32 %v1925_v58, %v1795_v2 }
 0x91c   :  { %v1797_v27 = vpop.f32.mrf.mxu1 }
 0x91d   :  { %v1811_v6 = vsel %vm1810_vm1, %v1807_v59, -1e+30 }
 0x91e   :  { %v2251_v36 = vpop.f32.mrf.mxu1  ;;  %1812 = vmax.xlane.f32.xlu0 %v1811_v6 }
 0x9a7   :  { %v1813_v11 = vpop.xlane.xlu0 %1812 }
 0x9a8   :  { %v1814_v17 = vsub.f32 %v1811_v6, %v1813_v11 }
 0x9aa   :  { %v1815_v25 = vmul.f32 1.442695, %v1814_v17 }
 0x9ac   :  { %2431 = vpow2.f32 %v1815_v25 }
 0x9b9   :  { %v2432_v41 = vpop.eup %2431 }
 0x9ba   :  { %1817 = vadd.xlane.f32.xlu1 %v2432_v41 }
 0xa43   :  { %v1818_v31 = vpop.xlane.xlu1 %1817 }
 0xa44   :  { %2433 = vlog2.f32 %v1818_v31 }
 0xa51   :  { %v2434_v20 = vpop.eup %2433 }
 0xa52   :  { %v1820_v7 = vmul.f32 0.6931472, %v2434_v20 }
 0xa54   :  { %v1821_v24 = vsub.f32 %v1814_v17, %v1820_v7 }
 0xa56   :  { %1822 = vst [vmem:[#allocation14] sm:$0xff] %v1821_v24 }
 0xa57   :  { %2573 = shalt.err (!%p2570_p1)
}
 0xa58   :  { %1832 = dma.vmem_to_hbm [thread:$0]  %s1830_s16, 128, %s3245_s11, [#allocation7]  }
 0xa59   :  { %2588 = dma.done.wait [#allocation7], 128  }
 0xa5a   :  { %2589 = vsyncadd [#allocation7], 4294967168 }
 0xa5b   :  { %1836 = vsyncpa [#allocation6], 1 }
 0xa5c   :  { %1837 = vsyncpa [#allocation9], 1 }
 0xa5d   :  { %1838 = vsyncpa [#allocation12], 1 }
 0xa5e   :  { %1839 = vsyncpa [#allocation7], 1 }

</bundles_post_ra>
